<compile_context>
chip_gen: v7x
topology: tpu7x:2x2x1
jax: 0.10.0
libtpu: 0.0.40
codegen_flags: <defaults>
</compile_context>

<pallas_src>
import jax
import jax.numpy as jnp
from jax.experimental import pallas as pl
from jax.experimental.pallas import tpu as pltpu


# ---------------------------------------------------------------------------
# Small helpers
# ---------------------------------------------------------------------------

def _round_up(n, m):
    return ((n + m - 1) // m) * m


def _row_tile(n, max_tile, align=16):
    """Pick a row tile: <= max_tile, 16-aligned (bf16 sublane pack), and split in two
    when the whole problem would otherwise be a single grid step (megacore)."""
    t = min(max_tile, n)
    if t == n and n >= 2 * align:
        t = _round_up((n + 1) // 2, align)
    return t


def _im2col_nhwc(x, k):
    # x: (B, H, W, C) -> (B, OH, OW, C*k*k); feature order (c, ky, kx) matches
    # torch's weight.reshape(OC, C*k*k).
    B, H, W, C = x.shape
    oh, ow = H - k + 1, W - k + 1
    cols = [x[:, ky:ky + oh, kx:kx + ow, :] for ky in range(k) for kx in range(k)]
    p = jnp.stack(cols, axis=3)            # (B, OH, OW, k*k, C)
    p = p.transpose(0, 1, 2, 4, 3)         # (B, OH, OW, C, k*k)
    return p.reshape(B, oh, ow, C * k * k)


def _pool_arrange(p):
    # (B, OH, OW, CK) -> (4, B*(OH//2)*(OW//2), CK); slab index = 2x2 pool offset,
    # rows ordered (b, pi, pj) so the kernel output reshapes straight to NHWC.
    B, OH, OW, CK = p.shape
    p6 = p.reshape(B, OH // 2, 2, OW // 2, 2, CK)
    pw = p6.transpose(2, 4, 0, 1, 3, 5)    # (2, 2, B, PH, PW, CK)
    return pw.reshape(4, B * (OH // 2) * (OW // 2), CK)


# ---------------------------------------------------------------------------
# Pallas kernels
# ---------------------------------------------------------------------------

def _conv1_pool_relu_kernel(p_ref, w_ref, b_ref, o_ref):
    # p_ref: (4, tn, 25) bf16 im2col patches (one slab per 2x2 pool offset)
    # w_ref: (25, 10) bf16; b_ref: (1, 10) f32; o_ref: (tn, 10) bf16
    d = None
    for s in range(4):                     # 4 dots + running max (no 4x-wide f32 temp)
        t = jnp.dot(p_ref[s], w_ref[...], preferred_element_type=jnp.float32)
        d = t if d is None else jnp.maximum(d, t)
    o_ref[...] = jnp.maximum(d + b_ref[...], 0.0).astype(o_ref.dtype)


def _conv2_mlp_kernel(p_ref, wc_ref, bc_ref, w1_ref, b1_ref, w2_ref, b2_ref, o_ref):
    # p_ref : (4, 16, bt, 256) bf16 conv2 patches; slab = pool offset, dim1 = pooled
    #         position (pi*4+pj), dim2 = image within the batch tile.
    # wc_ref: (256, 20) bf16 (K zero-padded 250->256), bc_ref: (1, 20) f32
    # w1_ref: (16, 20, 50) bf16 fc1 split per pooled position, b1_ref: (1, 50) f32
    # w2_ref: (50, 128) bf16 fc2 padded to 128 lanes, b2_ref: (1, 128) f32 with
    #         -1e30 on the pad columns (=> exactly zero probability after softmax)
    # o_ref : (bt, 128) f32 softmax probabilities (columns >= 10 are 0).
    npos, bt, ck = p_ref.shape[1], p_ref.shape[2], p_ref.shape[3]

    # conv2 + 2x2 max-pool: one dot per pool-offset slab, running max.
    d = None
    for s in range(4):
        x = p_ref[s].reshape(npos * bt, ck)        # bt % 8 == 0 -> layout no-op reshape
        t = jnp.dot(x, wc_ref[...], preferred_element_type=jnp.float32)
        d = t if d is None else jnp.maximum(d, t)
    act = jnp.maximum(d + bc_ref[...], 0.0)        # relu(maxpool(conv2)+b), (16*bt, 20)

    # fc1 over the flattened (channel, position) features as 16 position-block matmuls.
    h = None
    for pos in range(npos):
        a = act[pos * bt:(pos + 1) * bt, :].astype(jnp.bfloat16)   # (bt, 20)
        t = jnp.dot(a, w1_ref[pos], preferred_element_type=jnp.float32)
        h = t if h is None else h + t
    h = jnp.maximum(h + b1_ref[...], 0.0)          # (bt, 50)

    # TODO(synk): F.dropout is identity here (inference / eval mode).
    z = jnp.dot(h.astype(jnp.bfloat16), w2_ref[...],
                preferred_element_type=jnp.float32) + b2_ref[...]   # (bt, 128)
    z = z - jnp.max(z, axis=-1, keepdims=True)     # softmax over dim=1, f32, exact
    e = jnp.exp(z)
    o_ref[...] = e / jnp.sum(e, axis=-1, keepdims=True)


# ---------------------------------------------------------------------------
# Kernel wrappers
# ---------------------------------------------------------------------------

def conv1_pool_relu(x_nhwc, wmat, bmat):
    """relu(max_pool2d(conv1(x), 2)); x (B, 28, 28, 1) bf16 -> (B, 12, 12, 10) bf16."""
    B = x_nhwc.shape[0]
    k = 5
    ck, oc = wmat.shape
    ph, pw = (x_nhwc.shape[1] - k + 1) // 2, (x_nhwc.shape[2] - k + 1) // 2
    n = B * ph * pw                                        # always a multiple of 16
    patches = _pool_arrange(_im2col_nhwc(x_nhwc, k))       # (4, n, 25) bf16, no pad copy
    tn = _row_tile(n, 2048)
    cost = pl.CostEstimate(
        flops=2 * 4 * n * ck * oc,
        transcendentals=0,
        bytes_accessed=4 * n * ck * 2 + n * oc * 2 + ck * oc * 2 + oc * 4)
    out = pl.pallas_call(
        _conv1_pool_relu_kernel,
        out_shape=jax.ShapeDtypeStruct((n, oc), jnp.bfloat16),
        grid=(pl.cdiv(n, tn),),
        in_specs=[
            pl.BlockSpec((4, tn, ck), lambda i: (0, i, 0)),   # pipelined patch tiles
            pl.BlockSpec((ck, oc), lambda i: (0, 0)),         # weights stay resident
            pl.BlockSpec((1, oc), lambda i: (0, 0)),          # bias stays resident
        ],
        out_specs=pl.BlockSpec((tn, oc), lambda i: (i, 0)),
        compiler_params=pltpu.CompilerParams(
            dimension_semantics=("parallel",),
            vmem_limit_bytes=32 * 1024 * 1024),
        cost_estimate=cost,
    )(patches, wmat, bmat)
    return out.reshape(B, ph, pw, oc)                      # NHWC, bf16 (free reshape)


def conv2_mlp(a1, wc, bc, w1b, b1, w2p, b2p):
    """Fused conv2 -> maxpool -> relu -> flatten -> fc1 -> relu -> fc2 -> softmax."""
    B = a1.shape[0]
    k = 5
    b8 = _round_up(B, 8)
    if b8 != B:
        # Batch-only pad (tiny tensor) so the in-kernel (16, bt, ck)->(16*bt, ck)
        # reshape stays sublane-aligned; the big patch tensor is never pad-copied.
        a1 = jnp.pad(a1, ((0, b8 - B), (0, 0), (0, 0), (0, 0)))
    ck = wc.shape[0]                                       # 256 (250 zero-padded)
    p = _im2col_nhwc(a1, k)                                # (b8, 8, 8, 250) bf16
    p = jnp.pad(p, ((0, 0), (0, 0), (0, 0), (0, ck - p.shape[-1])))
    ph = p.shape[1] // 2                                   # 4
    npos = ph * ph                                         # 16
    # (dy, dx, pi, pj, b, feat): pool offsets outermost, pooled position, then image.
    p = p.reshape(b8, ph, 2, ph, 2, ck).transpose(2, 4, 1, 3, 0, 5)
    p = p.reshape(4, npos, b8, ck)

    bt = _row_tile(b8, 128)
    oc2 = wc.shape[1]                                      # 20
    h1, ocp = w1b.shape[2], w2p.shape[1]                   # 50, 128
    cost = pl.CostEstimate(
        flops=2 * b8 * (4 * npos * ck * oc2 + npos * oc2 * h1 + h1 * ocp),
        transcendentals=b8 * ocp,
        bytes_accessed=4 * npos * b8 * ck * 2 + b8 * ocp * 4
        + (ck * oc2 + npos * oc2 * h1 + h1 * ocp) * 2 + (oc2 + h1 + ocp) * 4)
    out = pl.pallas_call(
        _conv2_mlp_kernel,
        out_shape=jax.ShapeDtypeStruct((b8, ocp), jnp.float32),
        grid=(pl.cdiv(b8, bt),),
        in_specs=[
            pl.BlockSpec((4, npos, bt, ck), lambda i: (0, 0, i, 0)),
            pl.BlockSpec((ck, oc2), lambda i: (0, 0)),
            pl.BlockSpec((1, oc2), lambda i: (0, 0)),
            pl.BlockSpec((npos, oc2, h1), lambda i: (0, 0, 0)),
            pl.BlockSpec((1, h1), lambda i: (0, 0)),
            pl.BlockSpec((h1, ocp), lambda i: (0, 0)),
            pl.BlockSpec((1, ocp), lambda i: (0, 0)),
        ],
        out_specs=pl.BlockSpec((bt, ocp), lambda i: (i, 0)),
        compiler_params=pltpu.CompilerParams(
            dimension_semantics=("parallel",),
            vmem_limit_bytes=32 * 1024 * 1024),
        cost_estimate=cost,
    )(p, wc, bc, w1b, b1, w2p, b2p)
    return out[:B, :10]


# ---------------------------------------------------------------------------
# Parameters and forward pass
# ---------------------------------------------------------------------------

def init_params(key):
    # Deterministic PyTorch-default-style uniform init (U(-1/sqrt(fan_in), +)).
    ks = jax.random.split(key, 8)

    def u(k, shape, fan_in):
        bound = 1.0 / jnp.sqrt(jnp.float32(fan_in))
        return jax.random.uniform(k, shape, jnp.float32, -bound, bound)

    return {
        "conv1_w": u(ks[0], (10, 1, 5, 5), 1 * 25),
        "conv1_b": u(ks[1], (10,), 1 * 25),
        "conv2_w": u(ks[2], (20, 10, 5, 5), 10 * 25),
        "conv2_b": u(ks[3], (20,), 10 * 25),
        "fc1_w": u(ks[4], (50, 320), 320),
        "fc1_b": u(ks[5], (50,), 320),
        "fc2_w": u(ks[6], (10, 50), 50),
        "fc2_b": u(ks[7], (10,), 50),
    }


def prepare_params(params):
    """One-time weight re-layout / cast / padding, hoisted out of the jitted forward."""
    c1w = params["conv1_w"].reshape(10, 25).T.astype(jnp.bfloat16)             # (25, 10)
    c1b = params["conv1_b"].reshape(1, 10).astype(jnp.float32)
    c2w = params["conv2_w"].reshape(20, 250).T.astype(jnp.float32)             # (250, 20)
    c2w = jnp.zeros((256, 20), jnp.float32).at[:250].set(c2w).astype(jnp.bfloat16)
    c2b = params["conv2_b"].reshape(1, 20).astype(jnp.float32)
    # fc1 columns follow torch's NCHW flatten: index = c*16 + (pi*4 + pj).
    w1b = params["fc1_w"].reshape(50, 20, 16).transpose(2, 1, 0).astype(jnp.bfloat16)
    b1 = params["fc1_b"].reshape(1, 50).astype(jnp.float32)
    w2p = jnp.zeros((50, 128), jnp.float32).at[:, :10].set(params["fc2_w"].T)
    w2p = w2p.astype(jnp.bfloat16)
    b2p = jnp.full((1, 128), -1e30, jnp.float32).at[0, :10].set(params["fc2_b"])
    return {"c1_w": c1w, "c1_b": c1b, "c2_w": c2w, "c2_b": c2b,
            "fc1_w": w1b, "fc1_b": b1, "fc2_w": w2p, "fc2_b": b2p}


@jax.jit
def net_forward(prep, x):
    # x: (B, 1, 28, 28) NCHW float32 (fc1 in_features=320 implies a 28x28 input).
    a = jnp.transpose(x, (0, 2, 3, 1)).astype(jnp.bfloat16)   # NHWC bf16 MXU operands
    h = conv1_pool_relu(a, prep["c1_w"], prep["c1_b"])         # (B, 12, 12, 10) bf16
    # TODO(synk): Dropout2d / F.dropout are identity here (inference / eval mode).
    return conv2_mlp(h, prep["c2_w"], prep["c2_b"], prep["fc1_w"], prep["fc1_b"],
                     prep["fc2_w"], prep["fc2_b"])             # (B, 10) f32


def _ref_forward(params, x):
    # Pure-JAX f32 reference of the torch forward (eval mode), for validation.
    def conv_stage(a, w, b):
        oc, _, k, _ = w.shape
        p = _im2col_nhwc(a, k)                                        # (B, OH, OW, C*k*k)
        y = p @ w.reshape(oc, -1).T + b                               # conv2d, NHWC
        bsz, oh, ow, _ = y.shape
        y = y.reshape(bsz, oh // 2, 2, ow // 2, 2, oc).max(axis=(2, 4))   # max_pool2d
        return jnp.maximum(y, 0.0)                                    # relu

    a = jnp.transpose(x, (0, 2, 3, 1)).astype(jnp.float32)
    h = conv_stage(a, params["conv1_w"], params["conv1_b"])
    h = conv_stage(h, params["conv2_w"], params["conv2_b"])
    flat = jnp.transpose(h, (0, 3, 1, 2)).reshape(x.shape[0], 320)    # torch .view(-1, 320)
    h1 = jnp.maximum(flat @ params["fc1_w"].T + params["fc1_b"], 0.0)
    z = h1 @ params["fc2_w"].T + params["fc2_b"]
    return jax.nn.softmax(z, axis=-1)


if __name__ == "__main__":
    key = jax.random.PRNGKey(0)
    pkey, xkey = jax.random.split(key)
    params = init_params(pkey)
    prep = prepare_params(params)
    x = jax.random.normal(xkey, (2, 1, 28, 28), jnp.float32)

    y = net_forward(prep, x)
    jax.block_until_ready(y)
    assert y.shape == (2, 10)
    assert bool(jnp.all(jnp.isfinite(y)))
    # Rows are softmax probabilities (exact divide, f32 math).
    assert bool(jnp.allclose(jnp.sum(y, axis=-1), 1.0, atol=2e-3))
    # Cross-check against the pure-JAX f32 reference (loose tolerance for bf16 matmuls).
    y_ref = _ref_forward(params, x)
    assert bool(jnp.max(jnp.abs(y - y_ref)) < 5e-2)
    print("KERNEL_OK")
</pallas_src>

<mosaic_0001>
module attributes {stable_mosaic.version = 11 : i64} {
  func.func @_conv1_pool_relu_kernel(%arg0: i32, %arg1: memref<4x144x25xbf16, #tpu.memory_space<vmem>>, %arg2: memref<25x10xbf16, #tpu.memory_space<vmem>>, %arg3: memref<1x10xf32, #tpu.memory_space<vmem>>, %arg4: memref<144x10xbf16, #tpu.memory_space<vmem>>) attributes {dimension_semantics = [#tpu.dimension_semantics<parallel>], iteration_bounds = array<i64: 2>, scalar_prefetch = 0 : i64, scratch_operands = 0 : i64, tpu.core_type = #tpu.core_type<tc>, window_params = [{transform_indices = @transform_0, window_bounds = array<i64: 4, 144, 25>}, {pipeline_mode = #tpu.pipeline_mode<synchronous>, transform_indices = @transform_1, window_bounds = array<i64: 25, 10>}, {pipeline_mode = #tpu.pipeline_mode<synchronous>, transform_indices = @transform_2, window_bounds = array<i64: 1, 10>}, {transform_indices = @transform_3, window_bounds = array<i64: 144, 10>}]} {
    %c0 = arith.constant 0 : index
    %c0_0 = arith.constant 0 : index
    %c0_1 = arith.constant 0 : index
    %0 = vector.load %arg1[%c0, %c0_0, %c0_1] : memref<4x144x25xbf16, #tpu.memory_space<vmem>>, vector<1x144x25xbf16>
    %1 = vector.shape_cast %0 : vector<1x144x25xbf16> to vector<144x25xbf16>
    %c0_2 = arith.constant 0 : index
    %c0_3 = arith.constant 0 : index
    %2 = vector.load %arg2[%c0_2, %c0_3] : memref<25x10xbf16, #tpu.memory_space<vmem>>, vector<25x10xbf16>
    %cst = arith.constant dense<0.000000e+00> : vector<144x10xf32>
    %3 = tpu.matmul %1, %2, %cst {dimension_numbers = #tpu.dot_dimension_numbers<[1], [0], [0], [1], [0, 0, 1, 1], [], []>} : vector<144x25xbf16>, vector<25x10xbf16>, vector<144x10xf32> -> vector<144x10xf32>
    %c1 = arith.constant 1 : index
    %c0_4 = arith.constant 0 : index
    %c0_5 = arith.constant 0 : index
    %4 = vector.load %arg1[%c1, %c0_4, %c0_5] : memref<4x144x25xbf16, #tpu.memory_space<vmem>>, vector<1x144x25xbf16>
    %5 = vector.shape_cast %4 : vector<1x144x25xbf16> to vector<144x25xbf16>
    %c0_6 = arith.constant 0 : index
    %c0_7 = arith.constant 0 : index
    %6 = vector.load %arg2[%c0_6, %c0_7] : memref<25x10xbf16, #tpu.memory_space<vmem>>, vector<25x10xbf16>
    %cst_8 = arith.constant dense<0.000000e+00> : vector<144x10xf32>
    %7 = tpu.matmul %5, %6, %cst_8 {dimension_numbers = #tpu.dot_dimension_numbers<[1], [0], [0], [1], [0, 0, 1, 1], [], []>} : vector<144x25xbf16>, vector<25x10xbf16>, vector<144x10xf32> -> vector<144x10xf32>
    %8 = arith.maximumf %3, %7 : vector<144x10xf32>
    %c2 = arith.constant 2 : index
    %c0_9 = arith.constant 0 : index
    %c0_10 = arith.constant 0 : index
    %9 = vector.load %arg1[%c2, %c0_9, %c0_10] : memref<4x144x25xbf16, #tpu.memory_space<vmem>>, vector<1x144x25xbf16>
    %10 = vector.shape_cast %9 : vector<1x144x25xbf16> to vector<144x25xbf16>
    %c0_11 = arith.constant 0 : index
    %c0_12 = arith.constant 0 : index
    %11 = vector.load %arg2[%c0_11, %c0_12] : memref<25x10xbf16, #tpu.memory_space<vmem>>, vector<25x10xbf16>
    %cst_13 = arith.constant dense<0.000000e+00> : vector<144x10xf32>
    %12 = tpu.matmul %10, %11, %cst_13 {dimension_numbers = #tpu.dot_dimension_numbers<[1], [0], [0], [1], [0, 0, 1, 1], [], []>} : vector<144x25xbf16>, vector<25x10xbf16>, vector<144x10xf32> -> vector<144x10xf32>
    %13 = arith.maximumf %8, %12 : vector<144x10xf32>
    %c3 = arith.constant 3 : index
    %c0_14 = arith.constant 0 : index
    %c0_15 = arith.constant 0 : index
    %14 = vector.load %arg1[%c3, %c0_14, %c0_15] : memref<4x144x25xbf16, #tpu.memory_space<vmem>>, vector<1x144x25xbf16>
    %15 = vector.shape_cast %14 : vector<1x144x25xbf16> to vector<144x25xbf16>
    %c0_16 = arith.constant 0 : index
    %c0_17 = arith.constant 0 : index
    %16 = vector.load %arg2[%c0_16, %c0_17] : memref<25x10xbf16, #tpu.memory_space<vmem>>, vector<25x10xbf16>
    %cst_18 = arith.constant dense<0.000000e+00> : vector<144x10xf32>
    %17 = tpu.matmul %15, %16, %cst_18 {dimension_numbers = #tpu.dot_dimension_numbers<[1], [0], [0], [1], [0, 0, 1, 1], [], []>} : vector<144x25xbf16>, vector<25x10xbf16>, vector<144x10xf32> -> vector<144x10xf32>
    %18 = arith.maximumf %13, %17 : vector<144x10xf32>
    %c0_19 = arith.constant 0 : index
    %c0_20 = arith.constant 0 : index
    %19 = vector.load %arg3[%c0_19, %c0_20] : memref<1x10xf32, #tpu.memory_space<vmem>>, vector<1x10xf32>
    %20 = vector.broadcast %19 : vector<1x10xf32> to vector<144x10xf32>
    %21 = arith.addf %18, %20 : vector<144x10xf32>
    %cst_21 = arith.constant 0.000000e+00 : f32
    %22 = vector.broadcast %cst_21 : f32 to vector<144x10xf32>
    %23 = arith.maximumf %21, %22 : vector<144x10xf32>
    %24 = arith.truncf %23 : vector<144x10xf32> to vector<144x10xbf16>
    %c0_22 = arith.constant 0 : index
    %c0_23 = arith.constant 0 : index
    %25 = vector.load %arg4[%c0_22, %c0_23] : memref<144x10xbf16, #tpu.memory_space<vmem>>, vector<144x10xbf16>
    tpu.vector_store %arg4[%c0_22, %c0_23], %24 {strides = array<i32>} : memref<144x10xbf16, #tpu.memory_space<vmem>>, vector<144x10xbf16>,
    return
  }
  func.func @transform_0(%arg0: i32) -> (i32, i32, i32) {
    %c0_i32 = arith.constant 0 : i32
    %c0_i32_0 = arith.constant 0 : i32
    %c0_i32_1 = arith.constant 0 : i32
    return %c0_i32, %arg0, %c0_i32_0 : i32, i32, i32
  }
  func.func @transform_1(%arg0: i32) -> (i32, i32) {
    %c0_i32 = arith.constant 0 : i32
    %c0_i32_0 = arith.constant 0 : i32
    %c0_i32_1 = arith.constant 0 : i32
    return %c0_i32, %c0_i32_0 : i32, i32
  }
  func.func @transform_2(%arg0: i32) -> (i32, i32) {
    %c0_i32 = arith.constant 0 : i32
    %c0_i32_0 = arith.constant 0 : i32
    %c0_i32_1 = arith.constant 0 : i32
    return %c0_i32, %c0_i32_0 : i32, i32
  }
  func.func @transform_3(%arg0: i32) -> (i32, i32) {
    %c0_i32 = arith.constant 0 : i32
    %c0_i32_0 = arith.constant 0 : i32
    return %arg0, %c0_i32 : i32, i32
  }
}

module attributes {stable_mosaic.version = 11 : i64} {
  func.func @_conv2_mlp_kernel(%arg0: i32, %arg1: memref<4x16x8x256xbf16, #tpu.memory_space<vmem>>, %arg2: memref<256x20xbf16, #tpu.memory_space<vmem>>, %arg3: memref<1x20xf32, #tpu.memory_space<vmem>>, %arg4: memref<16x20x50xbf16, #tpu.memory_space<vmem>>, %arg5: memref<1x50xf32, #tpu.memory_space<vmem>>, %arg6: memref<50x128xbf16, #tpu.memory_space<vmem>>, %arg7: memref<1x128xf32, #tpu.memory_space<vmem>>, %arg8: memref<8x128xf32, #tpu.memory_space<vmem>>) attributes {dimension_semantics = [#tpu.dimension_semantics<parallel>], iteration_bounds = array<i64: 1>, scalar_prefetch = 0 : i64, scratch_operands = 0 : i64, tpu.core_type = #tpu.core_type<tc>, window_params = [{transform_indices = @transform_0, window_bounds = array<i64: 4, 16, 8, 256>}, {pipeline_mode = #tpu.pipeline_mode<synchronous>, transform_indices = @transform_1, window_bounds = array<i64: 256, 20>}, {pipeline_mode = #tpu.pipeline_mode<synchronous>, transform_indices = @transform_2, window_bounds = array<i64: 1, 20>}, {pipeline_mode = #tpu.pipeline_mode<synchronous>, transform_indices = @transform_3, window_bounds = array<i64: 16, 20, 50>}, {pipeline_mode = #tpu.pipeline_mode<synchronous>, transform_indices = @transform_4, window_bounds = array<i64: 1, 50>}, {pipeline_mode = #tpu.pipeline_mode<synchronous>, transform_indices = @transform_5, window_bounds = array<i64: 50, 128>}, {pipeline_mode = #tpu.pipeline_mode<synchronous>, transform_indices = @transform_6, window_bounds = array<i64: 1, 128>}, {transform_indices = @transform_7, window_bounds = array<i64: 8, 128>}]} {
    %c0 = arith.constant 0 : index
    %c0_0 = arith.constant 0 : index
    %c0_1 = arith.constant 0 : index
    %c0_2 = arith.constant 0 : index
    %0 = vector.load %arg1[%c0, %c0_0, %c0_1, %c0_2] : memref<4x16x8x256xbf16, #tpu.memory_space<vmem>>, vector<1x16x8x256xbf16>
    %1 = vector.shape_cast %0 : vector<1x16x8x256xbf16> to vector<16x8x256xbf16>
    %2 = vector.shape_cast %1 : vector<16x8x256xbf16> to vector<128x256xbf16>
    %c0_3 = arith.constant 0 : index
    %c0_4 = arith.constant 0 : index
    %3 = vector.load %arg2[%c0_3, %c0_4] : memref<256x20xbf16, #tpu.memory_space<vmem>>, vector<256x20xbf16>
    %cst = arith.constant dense<0.000000e+00> : vector<128x20xf32>
    %4 = tpu.matmul %2, %3, %cst {dimension_numbers = #tpu.dot_dimension_numbers<[1], [0], [0], [1], [0, 0, 1, 1], [], []>} : vector<128x256xbf16>, vector<256x20xbf16>, vector<128x20xf32> -> vector<128x20xf32>
    %c1 = arith.constant 1 : index
    %c0_5 = arith.constant 0 : index
    %c0_6 = arith.constant 0 : index
    %c0_7 = arith.constant 0 : index
    %5 = vector.load %arg1[%c1, %c0_5, %c0_6, %c0_7] : memref<4x16x8x256xbf16, #tpu.memory_space<vmem>>, vector<1x16x8x256xbf16>
    %6 = vector.shape_cast %5 : vector<1x16x8x256xbf16> to vector<16x8x256xbf16>
    %7 = vector.shape_cast %6 : vector<16x8x256xbf16> to vector<128x256xbf16>
    %c0_8 = arith.constant 0 : index
    %c0_9 = arith.constant 0 : index
    %8 = vector.load %arg2[%c0_8, %c0_9] : memref<256x20xbf16, #tpu.memory_space<vmem>>, vector<256x20xbf16>
    %cst_10 = arith.constant dense<0.000000e+00> : vector<128x20xf32>
    %9 = tpu.matmul %7, %8, %cst_10 {dimension_numbers = #tpu.dot_dimension_numbers<[1], [0], [0], [1], [0, 0, 1, 1], [], []>} : vector<128x256xbf16>, vector<256x20xbf16>, vector<128x20xf32> -> vector<128x20xf32>
    %10 = arith.maximumf %4, %9 : vector<128x20xf32>
    %c2 = arith.constant 2 : index
    %c0_11 = arith.constant 0 : index
    %c0_12 = arith.constant 0 : index
    %c0_13 = arith.constant 0 : index
    %11 = vector.load %arg1[%c2, %c0_11, %c0_12, %c0_13] : memref<4x16x8x256xbf16, #tpu.memory_space<vmem>>, vector<1x16x8x256xbf16>
    %12 = vector.shape_cast %11 : vector<1x16x8x256xbf16> to vector<16x8x256xbf16>
    %13 = vector.shape_cast %12 : vector<16x8x256xbf16> to vector<128x256xbf16>
    %c0_14 = arith.constant 0 : index
    %c0_15 = arith.constant 0 : index
    %14 = vector.load %arg2[%c0_14, %c0_15] : memref<256x20xbf16, #tpu.memory_space<vmem>>, vector<256x20xbf16>
    %cst_16 = arith.constant dense<0.000000e+00> : vector<128x20xf32>
    %15 = tpu.matmul %13, %14, %cst_16 {dimension_numbers = #tpu.dot_dimension_numbers<[1], [0], [0], [1], [0, 0, 1, 1], [], []>} : vector<128x256xbf16>, vector<256x20xbf16>, vector<128x20xf32> -> vector<128x20xf32>
    %16 = arith.maximumf %10, %15 : vector<128x20xf32>
    %c3 = arith.constant 3 : index
    %c0_17 = arith.constant 0 : index
    %c0_18 = arith.constant 0 : index
    %c0_19 = arith.constant 0 : index
    %17 = vector.load %arg1[%c3, %c0_17, %c0_18, %c0_19] : memref<4x16x8x256xbf16, #tpu.memory_space<vmem>>, vector<1x16x8x256xbf16>
    %18 = vector.shape_cast %17 : vector<1x16x8x256xbf16> to vector<16x8x256xbf16>
    %19 = vector.shape_cast %18 : vector<16x8x256xbf16> to vector<128x256xbf16>
    %c0_20 = arith.constant 0 : index
    %c0_21 = arith.constant 0 : index
    %20 = vector.load %arg2[%c0_20, %c0_21] : memref<256x20xbf16, #tpu.memory_space<vmem>>, vector<256x20xbf16>
    %cst_22 = arith.constant dense<0.000000e+00> : vector<128x20xf32>
    %21 = tpu.matmul %19, %20, %cst_22 {dimension_numbers = #tpu.dot_dimension_numbers<[1], [0], [0], [1], [0, 0, 1, 1], [], []>} : vector<128x256xbf16>, vector<256x20xbf16>, vector<128x20xf32> -> vector<128x20xf32>
    %22 = arith.maximumf %16, %21 : vector<128x20xf32>
    %c0_23 = arith.constant 0 : index
    %c0_24 = arith.constant 0 : index
    %23 = vector.load %arg3[%c0_23, %c0_24] : memref<1x20xf32, #tpu.memory_space<vmem>>, vector<1x20xf32>
    %24 = vector.broadcast %23 : vector<1x20xf32> to vector<128x20xf32>
    %25 = arith.addf %22, %24 : vector<128x20xf32>
    %cst_25 = arith.constant 0.000000e+00 : f32
    %26 = vector.broadcast %cst_25 : f32 to vector<128x20xf32>
    %27 = arith.maximumf %25, %26 : vector<128x20xf32>
    %28 = vector.extract_strided_slice %27 {offsets = [0, 0], sizes = [8, 20], strides = [1, 1]} : vector<128x20xf32> to vector<8x20xf32>
    %29 = arith.truncf %28 : vector<8x20xf32> to vector<8x20xbf16>
    %c0_26 = arith.constant 0 : index
    %c0_27 = arith.constant 0 : index
    %c0_28 = arith.constant 0 : index
    %30 = vector.load %arg4[%c0_26, %c0_27, %c0_28] : memref<16x20x50xbf16, #tpu.memory_space<vmem>>, vector<1x20x50xbf16>
    %31 = vector.shape_cast %30 : vector<1x20x50xbf16> to vector<20x50xbf16>
    %cst_29 = arith.constant dense<0.000000e+00> : vector<8x50xf32>
    %32 = tpu.matmul %29, %31, %cst_29 {dimension_numbers = #tpu.dot_dimension_numbers<[1], [0], [0], [1], [0, 0, 1, 1], [], []>} : vector<8x20xbf16>, vector<20x50xbf16>, vector<8x50xf32> -> vector<8x50xf32>
    %33 = vector.extract_strided_slice %27 {offsets = [8, 0], sizes = [8, 20], strides = [1, 1]} : vector<128x20xf32> to vector<8x20xf32>
    %34 = arith.truncf %33 : vector<8x20xf32> to vector<8x20xbf16>
    %c1_30 = arith.constant 1 : index
    %c0_31 = arith.constant 0 : index
    %c0_32 = arith.constant 0 : index
    %35 = vector.load %arg4[%c1_30, %c0_31, %c0_32] : memref<16x20x50xbf16, #tpu.memory_space<vmem>>, vector<1x20x50xbf16>
    %36 = vector.shape_cast %35 : vector<1x20x50xbf16> to vector<20x50xbf16>
    %cst_33 = arith.constant dense<0.000000e+00> : vector<8x50xf32>
    %37 = tpu.matmul %34, %36, %cst_33 {dimension_numbers = #tpu.dot_dimension_numbers<[1], [0], [0], [1], [0, 0, 1, 1], [], []>} : vector<8x20xbf16>, vector<20x50xbf16>, vector<8x50xf32> -> vector<8x50xf32>
    %38 = arith.addf %32, %37 : vector<8x50xf32>
    %39 = vector.extract_strided_slice %27 {offsets = [16, 0], sizes = [8, 20], strides = [1, 1]} : vector<128x20xf32> to vector<8x20xf32>
    %40 = arith.truncf %39 : vector<8x20xf32> to vector<8x20xbf16>
    %c2_34 = arith.constant 2 : index
    %c0_35 = arith.constant 0 : index
    %c0_36 = arith.constant 0 : index
    %41 = vector.load %arg4[%c2_34, %c0_35, %c0_36] : memref<16x20x50xbf16, #tpu.memory_space<vmem>>, vector<1x20x50xbf16>
    %42 = vector.shape_cast %41 : vector<1x20x50xbf16> to vector<20x50xbf16>
    %cst_37 = arith.constant dense<0.000000e+00> : vector<8x50xf32>
    %43 = tpu.matmul %40, %42, %cst_37 {dimension_numbers = #tpu.dot_dimension_numbers<[1], [0], [0], [1], [0, 0, 1, 1], [], []>} : vector<8x20xbf16>, vector<20x50xbf16>, vector<8x50xf32> -> vector<8x50xf32>
    %44 = arith.addf %38, %43 : vector<8x50xf32>
    %45 = vector.extract_strided_slice %27 {offsets = [24, 0], sizes = [8, 20], strides = [1, 1]} : vector<128x20xf32> to vector<8x20xf32>
    %46 = arith.truncf %45 : vector<8x20xf32> to vector<8x20xbf16>
    %c3_38 = arith.constant 3 : index
    %c0_39 = arith.constant 0 : index
    %c0_40 = arith.constant 0 : index
    %47 = vector.load %arg4[%c3_38, %c0_39, %c0_40] : memref<16x20x50xbf16, #tpu.memory_space<vmem>>, vector<1x20x50xbf16>
    %48 = vector.shape_cast %47 : vector<1x20x50xbf16> to vector<20x50xbf16>
    %cst_41 = arith.constant dense<0.000000e+00> : vector<8x50xf32>
    %49 = tpu.matmul %46, %48, %cst_41 {dimension_numbers = #tpu.dot_dimension_numbers<[1], [0], [0], [1], [0, 0, 1, 1], [], []>} : vector<8x20xbf16>, vector<20x50xbf16>, vector<8x50xf32> -> vector<8x50xf32>
    %50 = arith.addf %44, %49 : vector<8x50xf32>
    %51 = vector.extract_strided_slice %27 {offsets = [32, 0], sizes = [8, 20], strides = [1, 1]} : vector<128x20xf32> to vector<8x20xf32>
    %52 = arith.truncf %51 : vector<8x20xf32> to vector<8x20xbf16>
    %c4 = arith.constant 4 : index
    %c0_42 = arith.constant 0 : index
    %c0_43 = arith.constant 0 : index
    %53 = vector.load %arg4[%c4, %c0_42, %c0_43] : memref<16x20x50xbf16, #tpu.memory_space<vmem>>, vector<1x20x50xbf16>
    %54 = vector.shape_cast %53 : vector<1x20x50xbf16> to vector<20x50xbf16>
    %cst_44 = arith.constant dense<0.000000e+00> : vector<8x50xf32>
    %55 = tpu.matmul %52, %54, %cst_44 {dimension_numbers = #tpu.dot_dimension_numbers<[1], [0], [0], [1], [0, 0, 1, 1], [], []>} : vector<8x20xbf16>, vector<20x50xbf16>, vector<8x50xf32> -> vector<8x50xf32>
    %56 = arith.addf %50, %55 : vector<8x50xf32>
    %57 = vector.extract_strided_slice %27 {offsets = [40, 0], sizes = [8, 20], strides = [1, 1]} : vector<128x20xf32> to vector<8x20xf32>
    %58 = arith.truncf %57 : vector<8x20xf32> to vector<8x20xbf16>
    %c5 = arith.constant 5 : index
    %c0_45 = arith.constant 0 : index
    %c0_46 = arith.constant 0 : index
    %59 = vector.load %arg4[%c5, %c0_45, %c0_46] : memref<16x20x50xbf16, #tpu.memory_space<vmem>>, vector<1x20x50xbf16>
    %60 = vector.shape_cast %59 : vector<1x20x50xbf16> to vector<20x50xbf16>
    %cst_47 = arith.constant dense<0.000000e+00> : vector<8x50xf32>
    %61 = tpu.matmul %58, %60, %cst_47 {dimension_numbers = #tpu.dot_dimension_numbers<[1], [0], [0], [1], [0, 0, 1, 1], [], []>} : vector<8x20xbf16>, vector<20x50xbf16>, vector<8x50xf32> -> vector<8x50xf32>
    %62 = arith.addf %56, %61 : vector<8x50xf32>
    %63 = vector.extract_strided_slice %27 {offsets = [48, 0], sizes = [8, 20], strides = [1, 1]} : vector<128x20xf32> to vector<8x20xf32>
    %64 = arith.truncf %63 : vector<8x20xf32> to vector<8x20xbf16>
    %c6 = arith.constant 6 : index
    %c0_48 = arith.constant 0 : index
    %c0_49 = arith.constant 0 : index
    %65 = vector.load %arg4[%c6, %c0_48, %c0_49] : memref<16x20x50xbf16, #tpu.memory_space<vmem>>, vector<1x20x50xbf16>
    %66 = vector.shape_cast %65 : vector<1x20x50xbf16> to vector<20x50xbf16>
    %cst_50 = arith.constant dense<0.000000e+00> : vector<8x50xf32>
    %67 = tpu.matmul %64, %66, %cst_50 {dimension_numbers = #tpu.dot_dimension_numbers<[1], [0], [0], [1], [0, 0, 1, 1], [], []>} : vector<8x20xbf16>, vector<20x50xbf16>, vector<8x50xf32> -> vector<8x50xf32>
    %68 = arith.addf %62, %67 : vector<8x50xf32>
    %69 = vector.extract_strided_slice %27 {offsets = [56, 0], sizes = [8, 20], strides = [1, 1]} : vector<128x20xf32> to vector<8x20xf32>
    %70 = arith.truncf %69 : vector<8x20xf32> to vector<8x20xbf16>
    %c7 = arith.constant 7 : index
    %c0_51 = arith.constant 0 : index
    %c0_52 = arith.constant 0 : index
    %71 = vector.load %arg4[%c7, %c0_51, %c0_52] : memref<16x20x50xbf16, #tpu.memory_space<vmem>>, vector<1x20x50xbf16>
    %72 = vector.shape_cast %71 : vector<1x20x50xbf16> to vector<20x50xbf16>
    %cst_53 = arith.constant dense<0.000000e+00> : vector<8x50xf32>
    %73 = tpu.matmul %70, %72, %cst_53 {dimension_numbers = #tpu.dot_dimension_numbers<[1], [0], [0], [1], [0, 0, 1, 1], [], []>} : vector<8x20xbf16>, vector<20x50xbf16>, vector<8x50xf32> -> vector<8x50xf32>
    %74 = arith.addf %68, %73 : vector<8x50xf32>
    %75 = vector.extract_strided_slice %27 {offsets = [64, 0], sizes = [8, 20], strides = [1, 1]} : vector<128x20xf32> to vector<8x20xf32>
    %76 = arith.truncf %75 : vector<8x20xf32> to vector<8x20xbf16>
    %c8 = arith.constant 8 : index
    %c0_54 = arith.constant 0 : index
    %c0_55 = arith.constant 0 : index
    %77 = vector.load %arg4[%c8, %c0_54, %c0_55] : memref<16x20x50xbf16, #tpu.memory_space<vmem>>, vector<1x20x50xbf16>
    %78 = vector.shape_cast %77 : vector<1x20x50xbf16> to vector<20x50xbf16>
    %cst_56 = arith.constant dense<0.000000e+00> : vector<8x50xf32>
    %79 = tpu.matmul %76, %78, %cst_56 {dimension_numbers = #tpu.dot_dimension_numbers<[1], [0], [0], [1], [0, 0, 1, 1], [], []>} : vector<8x20xbf16>, vector<20x50xbf16>, vector<8x50xf32> -> vector<8x50xf32>
    %80 = arith.addf %74, %79 : vector<8x50xf32>
    %81 = vector.extract_strided_slice %27 {offsets = [72, 0], sizes = [8, 20], strides = [1, 1]} : vector<128x20xf32> to vector<8x20xf32>
    %82 = arith.truncf %81 : vector<8x20xf32> to vector<8x20xbf16>
    %c9 = arith.constant 9 : index
    %c0_57 = arith.constant 0 : index
    %c0_58 = arith.constant 0 : index
    %83 = vector.load %arg4[%c9, %c0_57, %c0_58] : memref<16x20x50xbf16, #tpu.memory_space<vmem>>, vector<1x20x50xbf16>
    %84 = vector.shape_cast %83 : vector<1x20x50xbf16> to vector<20x50xbf16>
    %cst_59 = arith.constant dense<0.000000e+00> : vector<8x50xf32>
    %85 = tpu.matmul %82, %84, %cst_59 {dimension_numbers = #tpu.dot_dimension_numbers<[1], [0], [0], [1], [0, 0, 1, 1], [], []>} : vector<8x20xbf16>, vector<20x50xbf16>, vector<8x50xf32> -> vector<8x50xf32>
    %86 = arith.addf %80, %85 : vector<8x50xf32>
    %87 = vector.extract_strided_slice %27 {offsets = [80, 0], sizes = [8, 20], strides = [1, 1]} : vector<128x20xf32> to vector<8x20xf32>
    %88 = arith.truncf %87 : vector<8x20xf32> to vector<8x20xbf16>
    %c10 = arith.constant 10 : index
    %c0_60 = arith.constant 0 : index
    %c0_61 = arith.constant 0 : index
    %89 = vector.load %arg4[%c10, %c0_60, %c0_61] : memref<16x20x50xbf16, #tpu.memory_space<vmem>>, vector<1x20x50xbf16>
    %90 = vector.shape_cast %89 : vector<1x20x50xbf16> to vector<20x50xbf16>
    %cst_62 = arith.constant dense<0.000000e+00> : vector<8x50xf32>
    %91 = tpu.matmul %88, %90, %cst_62 {dimension_numbers = #tpu.dot_dimension_numbers<[1], [0], [0], [1], [0, 0, 1, 1], [], []>} : vector<8x20xbf16>, vector<20x50xbf16>, vector<8x50xf32> -> vector<8x50xf32>
    %92 = arith.addf %86, %91 : vector<8x50xf32>
    %93 = vector.extract_strided_slice %27 {offsets = [88, 0], sizes = [8, 20], strides = [1, 1]} : vector<128x20xf32> to vector<8x20xf32>
    %94 = arith.truncf %93 : vector<8x20xf32> to vector<8x20xbf16>
    %c11 = arith.constant 11 : index
    %c0_63 = arith.constant 0 : index
    %c0_64 = arith.constant 0 : index
    %95 = vector.load %arg4[%c11, %c0_63, %c0_64] : memref<16x20x50xbf16, #tpu.memory_space<vmem>>, vector<1x20x50xbf16>
    %96 = vector.shape_cast %95 : vector<1x20x50xbf16> to vector<20x50xbf16>
    %cst_65 = arith.constant dense<0.000000e+00> : vector<8x50xf32>
    %97 = tpu.matmul %94, %96, %cst_65 {dimension_numbers = #tpu.dot_dimension_numbers<[1], [0], [0], [1], [0, 0, 1, 1], [], []>} : vector<8x20xbf16>, vector<20x50xbf16>, vector<8x50xf32> -> vector<8x50xf32>
    %98 = arith.addf %92, %97 : vector<8x50xf32>
    %99 = vector.extract_strided_slice %27 {offsets = [96, 0], sizes = [8, 20], strides = [1, 1]} : vector<128x20xf32> to vector<8x20xf32>
    %100 = arith.truncf %99 : vector<8x20xf32> to vector<8x20xbf16>
    %c12 = arith.constant 12 : index
    %c0_66 = arith.constant 0 : index
    %c0_67 = arith.constant 0 : index
    %101 = vector.load %arg4[%c12, %c0_66, %c0_67] : memref<16x20x50xbf16, #tpu.memory_space<vmem>>, vector<1x20x50xbf16>
    %102 = vector.shape_cast %101 : vector<1x20x50xbf16> to vector<20x50xbf16>
    %cst_68 = arith.constant dense<0.000000e+00> : vector<8x50xf32>
    %103 = tpu.matmul %100, %102, %cst_68 {dimension_numbers = #tpu.dot_dimension_numbers<[1], [0], [0], [1], [0, 0, 1, 1], [], []>} : vector<8x20xbf16>, vector<20x50xbf16>, vector<8x50xf32> -> vector<8x50xf32>
    %104 = arith.addf %98, %103 : vector<8x50xf32>
    %105 = vector.extract_strided_slice %27 {offsets = [104, 0], sizes = [8, 20], strides = [1, 1]} : vector<128x20xf32> to vector<8x20xf32>
    %106 = arith.truncf %105 : vector<8x20xf32> to vector<8x20xbf16>
    %c13 = arith.constant 13 : index
    %c0_69 = arith.constant 0 : index
    %c0_70 = arith.constant 0 : index
    %107 = vector.load %arg4[%c13, %c0_69, %c0_70] : memref<16x20x50xbf16, #tpu.memory_space<vmem>>, vector<1x20x50xbf16>
    %108 = vector.shape_cast %107 : vector<1x20x50xbf16> to vector<20x50xbf16>
    %cst_71 = arith.constant dense<0.000000e+00> : vector<8x50xf32>
    %109 = tpu.matmul %106, %108, %cst_71 {dimension_numbers = #tpu.dot_dimension_numbers<[1], [0], [0], [1], [0, 0, 1, 1], [], []>} : vector<8x20xbf16>, vector<20x50xbf16>, vector<8x50xf32> -> vector<8x50xf32>
    %110 = arith.addf %104, %109 : vector<8x50xf32>
    %111 = vector.extract_strided_slice %27 {offsets = [112, 0], sizes = [8, 20], strides = [1, 1]} : vector<128x20xf32> to vector<8x20xf32>
    %112 = arith.truncf %111 : vector<8x20xf32> to vector<8x20xbf16>
    %c14 = arith.constant 14 : index
    %c0_72 = arith.constant 0 : index
    %c0_73 = arith.constant 0 : index
    %113 = vector.load %arg4[%c14, %c0_72, %c0_73] : memref<16x20x50xbf16, #tpu.memory_space<vmem>>, vector<1x20x50xbf16>
    %114 = vector.shape_cast %113 : vector<1x20x50xbf16> to vector<20x50xbf16>
    %cst_74 = arith.constant dense<0.000000e+00> : vector<8x50xf32>
    %115 = tpu.matmul %112, %114, %cst_74 {dimension_numbers = #tpu.dot_dimension_numbers<[1], [0], [0], [1], [0, 0, 1, 1], [], []>} : vector<8x20xbf16>, vector<20x50xbf16>, vector<8x50xf32> -> vector<8x50xf32>
    %116 = arith.addf %110, %115 : vector<8x50xf32>
    %117 = vector.extract_strided_slice %27 {offsets = [120, 0], sizes = [8, 20], strides = [1, 1]} : vector<128x20xf32> to vector<8x20xf32>
    %118 = arith.truncf %117 : vector<8x20xf32> to vector<8x20xbf16>
    %c15 = arith.constant 15 : index
    %c0_75 = arith.constant 0 : index
    %c0_76 = arith.constant 0 : index
    %119 = vector.load %arg4[%c15, %c0_75, %c0_76] : memref<16x20x50xbf16, #tpu.memory_space<vmem>>, vector<1x20x50xbf16>
    %120 = vector.shape_cast %119 : vector<1x20x50xbf16> to vector<20x50xbf16>
    %cst_77 = arith.constant dense<0.000000e+00> : vector<8x50xf32>
    %121 = tpu.matmul %118, %120, %cst_77 {dimension_numbers = #tpu.dot_dimension_numbers<[1], [0], [0], [1], [0, 0, 1, 1], [], []>} : vector<8x20xbf16>, vector<20x50xbf16>, vector<8x50xf32> -> vector<8x50xf32>
    %122 = arith.addf %116, %121 : vector<8x50xf32>
    %c0_78 = arith.constant 0 : index
    %c0_79 = arith.constant 0 : index
    %123 = vector.load %arg5[%c0_78, %c0_79] : memref<1x50xf32, #tpu.memory_space<vmem>>, vector<1x50xf32>
    %124 = vector.broadcast %123 : vector<1x50xf32> to vector<8x50xf32>
    %125 = arith.addf %122, %124 : vector<8x50xf32>
    %cst_80 = arith.constant 0.000000e+00 : f32
    %126 = vector.broadcast %cst_80 : f32 to vector<8x50xf32>
    %127 = arith.maximumf %125, %126 : vector<8x50xf32>
    %128 = arith.truncf %127 : vector<8x50xf32> to vector<8x50xbf16>
    %c0_81 = arith.constant 0 : index
    %c0_82 = arith.constant 0 : index
    %129 = vector.load %arg6[%c0_81, %c0_82] : memref<50x128xbf16, #tpu.memory_space<vmem>>, vector<50x128xbf16>
    %cst_83 = arith.constant dense<0.000000e+00> : vector<8x128xf32>
    %130 = tpu.matmul %128, %129, %cst_83 {dimension_numbers = #tpu.dot_dimension_numbers<[1], [0], [0], [1], [0, 0, 1, 1], [], []>} : vector<8x50xbf16>, vector<50x128xbf16>, vector<8x128xf32> -> vector<8x128xf32>
    %c0_84 = arith.constant 0 : index
    %c0_85 = arith.constant 0 : index
    %131 = vector.load %arg7[%c0_84, %c0_85] : memref<1x128xf32, #tpu.memory_space<vmem>>, vector<1x128xf32>
    %132 = vector.broadcast %131 : vector<1x128xf32> to vector<8x128xf32>
    %133 = arith.addf %130, %132 : vector<8x128xf32>
    %cst_86 = arith.constant dense<0xFF800000> : vector<8xf32>
    %134 = vector.multi_reduction <maximumf>, %133, %cst_86 [1] : vector<8x128xf32> to vector<8xf32>
    %135 = vector.shape_cast %134 : vector<8xf32> to vector<8x1xf32>
    %136 = vector.broadcast %135 : vector<8x1xf32> to vector<8x128xf32>
    %137 = arith.subf %133, %136 : vector<8x128xf32>
    %138 = math.exp %137 : vector<8x128xf32>
    %cst_87 = arith.constant dense<0.000000e+00> : vector<8xf32>
    %139 = vector.multi_reduction <add>, %138, %cst_87 [1] : vector<8x128xf32> to vector<8xf32>
    %140 = vector.shape_cast %139 : vector<8xf32> to vector<8x1xf32>
    %141 = vector.broadcast %140 : vector<8x1xf32> to vector<8x128xf32>
    %142 = arith.divf %138, %141 : vector<8x128xf32>
    %c0_88 = arith.constant 0 : index
    %c0_89 = arith.constant 0 : index
    %143 = vector.load %arg8[%c0_88, %c0_89] : memref<8x128xf32, #tpu.memory_space<vmem>>, vector<8x128xf32>
    tpu.vector_store %arg8[%c0_88, %c0_89], %142 {strides = array<i32>} : memref<8x128xf32, #tpu.memory_space<vmem>>, vector<8x128xf32>,
    return
  }
  func.func @transform_0(%arg0: i32) -> (i32, i32, i32, i32) {
    %c0_i32 = arith.constant 0 : i32
    %c0_i32_0 = arith.constant 0 : i32
    %c0_i32_1 = arith.constant 0 : i32
    %c0_i32_2 = arith.constant 0 : i32
    return %c0_i32, %c0_i32_0, %arg0, %c0_i32_1 : i32, i32, i32, i32
  }
  func.func @transform_1(%arg0: i32) -> (i32, i32) {
    %c0_i32 = arith.constant 0 : i32
    %c0_i32_0 = arith.constant 0 : i32
    %c0_i32_1 = arith.constant 0 : i32
    return %c0_i32, %c0_i32_0 : i32, i32
  }
  func.func @transform_2(%arg0: i32) -> (i32, i32) {
    %c0_i32 = arith.constant 0 : i32
    %c0_i32_0 = arith.constant 0 : i32
    %c0_i32_1 = arith.constant 0 : i32
    return %c0_i32, %c0_i32_0 : i32, i32
  }
  func.func @transform_3(%arg0: i32) -> (i32, i32, i32) {
    %c0_i32 = arith.constant 0 : i32
    %c0_i32_0 = arith.constant 0 : i32
    %c0_i32_1 = arith.constant 0 : i32
    %c0_i32_2 = arith.constant 0 : i32
    return %c0_i32, %c0_i32_0, %c0_i32_1 : i32, i32, i32
  }
  func.func @transform_4(%arg0: i32) -> (i32, i32) {
    %c0_i32 = arith.constant 0 : i32
    %c0_i32_0 = arith.constant 0 : i32
    %c0_i32_1 = arith.constant 0 : i32
    return %c0_i32, %c0_i32_0 : i32, i32
  }
  func.func @transform_5(%arg0: i32) -> (i32, i32) {
    %c0_i32 = arith.constant 0 : i32
    %c0_i32_0 = arith.constant 0 : i32
    %c0_i32_1 = arith.constant 0 : i32
    return %c0_i32, %c0_i32_0 : i32, i32
  }
  func.func @transform_6(%arg0: i32) -> (i32, i32) {
    %c0_i32 = arith.constant 0 : i32
    %c0_i32_0 = arith.constant 0 : i32
    %c0_i32_1 = arith.constant 0 : i32
    return %c0_i32, %c0_i32_0 : i32, i32
  }
  func.func @transform_7(%arg0: i32) -> (i32, i32) {
    %c0_i32 = arith.constant 0 : i32
    %c0_i32_0 = arith.constant 0 : i32
    return %arg0, %c0_i32 : i32, i32
  }
}

</mosaic_0001>

<bundles_post_ra>
// kernel: net_forward.2
= control target key start
LH: loop header
LB: loop body
LE: loop exit
PB: predicated region body
PF: predicated region fallthrough
CT: control target
= control target key end

     0   :  { %s2049_s12 = smov 0   ;;  %s2051_s13 = smov 0   ;;  %s2560_s0 = inlined_call_operand.vmem [shape: bf16[4,288,25], index: 0, kind: input, shape index: {}]   ;;  %s2561_s1 = inlined_call_operand.vmem [shape: bf16[25,10], index: 1, kind: input, shape index: {}]   ;;  %s2562_s2 = inlined_call_operand.vmem [shape: f32[1,10], index: 2, kind: input, shape index: {}]   ;;  %s2563_s3 = inlined_call_operand.vmem [shape: bf16[288,10], index: 3, kind: output, shape index: {}]  }
   0x1   :  { %s2053_s14 = smov 0  }
   0x2 LB: > { %s1556_s15 = sadd.s32 4294967295, %s2024_s14   ;;  %s2066_s16 = sadd.s32 1, %s2024_s14   ;;  %s2024_s14 = sphi %s2053_s14, %s2568_s14   ;;  %s2020_s13 = sphi %s2051_s13, %s2567_s13   ;;  %s2016_s12 = sphi %s2049_s12, %s2566_s12  }
   0x3   : > { %s17_s17 = ssub.s32 %s2024_s14, %s2066_s16  ;;  %s20_s18 = sadd.s32 1, %s2020_s13 }
   0x4   : > { %p18_p0 = scmp.eq.s32.totalorder %s17_s17, 0  ;;  %p27_p1 = scmp.ne.s32.totalorder %s2020_s13, %s2016_s12 }
   0x5   : > { %p28_p2 = scmp.eq.s32.totalorder %s2024_s14, 0  ;;  %p1559_p4 = scmp.ge.s32.totalorder %s2024_s14, 2 }
   0x6   : > { %s2075_s19 = scalar_select %p18_p0, %s2020_s13, %s20_s18  }
   0x7   : > { %p29_p3 = por %p28_p2, %p27_p1  ;;  %127 = sbr.rel (%p1559_p4) target bundleno = 37 (0x25), region = 24 }
   0xe   : > { %130 = sbr.rel (!%p29_p3) target bundleno = 37 (0x25), region = 28  ;;  %s132_s20 = sand.u32 (%p29_p3), 1, %s2020_s13  }
   0xf   : > { %s1712_s21 = smul.u32 (%p29_p3), 72, %s2024_s14 }
  0x10   : > { %s1935_s22 = smul.u32 (%p29_p3), 288, %s132_s20 }
  0x11   : > { %s2083_s25 = scalar_lea.vmem (%p29_p3), %s2560_s0, %s1712_s21 }
  0x12   : > { %v153_v0 = vld [vmem:[%s2083_s25] sm:$0xff] (%p29_p3)   ;;  %v157_v1 = vld [vmem:[%s2083_s25 + $0x8] sm:$0xff] (%p29_p3)   ;;  %v161_v2 = vld [vmem:[%s2083_s25 + $0x10] sm:$0xff] (%p29_p3)   ;;  %s2088_s26 = scalar_lea.vmem (%p29_p3), [#allocation2], %s1935_s22 }
  0x13   : > { %154 = vst [vmem:[%s2088_s26] sm:$0xff] (%p29_p3), %v153_v0   ;;  %158 = vst [vmem:[%s2088_s26 + $0x8] sm:$0xff] (%p29_p3), %v157_v1   ;;  %v165_v3 = vld [vmem:[%s2083_s25 + $0x18] sm:$0xff] (%p29_p3)   ;;  %v169_v4 = vld [vmem:[%s2083_s25 + $0x20] sm:$0xff] (%p29_p3)  }
  0x14   : > { %162 = vst [vmem:[%s2088_s26 + $0x10] sm:$0xff] (%p29_p3), %v161_v2   ;;  %v173_v5 = vld [vmem:[%s2083_s25 + $0x28] sm:$0xff] (%p29_p3)   ;;  %166 = vst [vmem:[%s2088_s26 + $0x18] sm:$0xff] (%p29_p3), %v165_v3   ;;  %v177_v6 = vld [vmem:[%s2083_s25 + $0x30] sm:$0xff] (%p29_p3)  }
  0x15   : > { %170 = vst [vmem:[%s2088_s26 + $0x20] sm:$0xff] %v169_v4   ;;  %174 = vst [vmem:[%s2088_s26 + $0x28] sm:$0xff] %v173_v5   ;;  %v181_v7 = vld [vmem:[%s2083_s25 + $0x38] sm:$0xff]   ;;  %v185_v8 = vld [vmem:[%s2083_s25 + $0x40] sm:$0xff]  }
  0x16   : > { %178 = vst [vmem:[%s2088_s26 + $0x30] sm:$0xff] %v177_v6   ;;  %182 = vst [vmem:[%s2088_s26 + $0x38] sm:$0xff] %v181_v7   ;;  %v189_v9 = vld [vmem:[%s2083_s25 + $0x90] sm:$0xff]   ;;  %v193_v10 = vld [vmem:[%s2083_s25 + $0x98] sm:$0xff]  }
  0x17   : > { %186 = vst [vmem:[%s2088_s26 + $0x40] sm:$0xff] %v185_v8   ;;  %v197_v11 = vld [vmem:[%s2083_s25 + $0xa0] sm:$0xff]   ;;  %190 = vst [vmem:[%s2088_s26 + $0x48] sm:$0xff] %v189_v9   ;;  %v201_v12 = vld [vmem:[%s2083_s25 + $0xa8] sm:$0xff]  }
  0x18   : > { %194 = vst [vmem:[%s2088_s26 + $0x50] sm:$0xff] %v193_v10   ;;  %198 = vst [vmem:[%s2088_s26 + $0x58] sm:$0xff] %v197_v11   ;;  %v205_v13 = vld [vmem:[%s2083_s25 + $0xb0] sm:$0xff]   ;;  %v209_v14 = vld [vmem:[%s2083_s25 + $0xb8] sm:$0xff]  }
  0x19   : > { %202 = vst [vmem:[%s2088_s26 + $0x60] sm:$0xff] %v201_v12   ;;  %206 = vst [vmem:[%s2088_s26 + $0x68] sm:$0xff] %v205_v13   ;;  %v213_v15 = vld [vmem:[%s2083_s25 + $0xc0] sm:$0xff]   ;;  %v217_v16 = vld [vmem:[%s2083_s25 + $0xc8] sm:$0xff]  }
  0x1a   : > { %210 = vst [vmem:[%s2088_s26 + $0x70] sm:$0xff] %v209_v14   ;;  %v221_v17 = vld [vmem:[%s2083_s25 + $0xd0] sm:$0xff]   ;;  %214 = vst [vmem:[%s2088_s26 + $0x78] sm:$0xff] %v213_v15   ;;  %v225_v18 = vld [vmem:[%s2083_s25 + $0x120] sm:$0xff]  }
  0x1b   : > { %218 = vst [vmem:[%s2088_s26 + $0x80] sm:$0xff] %v217_v16   ;;  %222 = vst [vmem:[%s2088_s26 + $0x88] sm:$0xff] %v221_v17   ;;  %v229_v19 = vld [vmem:[%s2083_s25 + $0x128] sm:$0xff]   ;;  %v233_v20 = vld [vmem:[%s2083_s25 + $0x130] sm:$0xff]  }
  0x1c   : > { %226 = vst [vmem:[%s2088_s26 + $0x90] sm:$0xff] %v225_v18   ;;  %230 = vst [vmem:[%s2088_s26 + $0x98] sm:$0xff] %v229_v19   ;;  %v237_v21 = vld [vmem:[%s2083_s25 + $0x138] sm:$0xff]   ;;  %v241_v22 = vld [vmem:[%s2083_s25 + $0x140] sm:$0xff]  }
  0x1d   : > { %234 = vst [vmem:[%s2088_s26 + $0xa0] sm:$0xff] %v233_v20   ;;  %v245_v23 = vld [vmem:[%s2083_s25 + $0x148] sm:$0xff]   ;;  %238 = vst [vmem:[%s2088_s26 + $0xa8] sm:$0xff] %v237_v21   ;;  %v249_v24 = vld [vmem:[%s2083_s25 + $0x150] sm:$0xff]  }
  0x1e   : > { %242 = vst [vmem:[%s2088_s26 + $0xb0] sm:$0xff] %v241_v22   ;;  %246 = vst [vmem:[%s2088_s26 + $0xb8] sm:$0xff] %v245_v23   ;;  %v253_v25 = vld [vmem:[%s2083_s25 + $0x158] sm:$0xff]   ;;  %v257_v26 = vld [vmem:[%s2083_s25 + $0x160] sm:$0xff]  }
  0x1f   : > { %250 = vst [vmem:[%s2088_s26 + $0xc0] sm:$0xff] %v249_v24   ;;  %254 = vst [vmem:[%s2088_s26 + $0xc8] sm:$0xff] %v253_v25   ;;  %v261_v27 = vld [vmem:[%s2083_s25 + $0x1b0] sm:$0xff]   ;;  %v265_v28 = vld [vmem:[%s2083_s25 + $0x1b8] sm:$0xff]  }
  0x20   : > { %258 = vst [vmem:[%s2088_s26 + $0xd0] sm:$0xff] %v257_v26   ;;  %v269_v29 = vld [vmem:[%s2083_s25 + $0x1c0] sm:$0xff]   ;;  %262 = vst [vmem:[%s2088_s26 + $0xd8] sm:$0xff] %v261_v27   ;;  %v273_v30 = vld [vmem:[%s2083_s25 + $0x1c8] sm:$0xff]  }
  0x21   : > { %266 = vst [vmem:[%s2088_s26 + $0xe0] sm:$0xff] %v265_v28   ;;  %270 = vst [vmem:[%s2088_s26 + $0xe8] sm:$0xff] %v269_v29   ;;  %v277_v31 = vld [vmem:[%s2083_s25 + $0x1d0] sm:$0xff]   ;;  %v281_v32 = vld [vmem:[%s2083_s25 + $0x1d8] sm:$0xff]  }
  0x22   : > { %274 = vst [vmem:[%s2088_s26 + $0xf0] sm:$0xff] %v273_v30   ;;  %278 = vst [vmem:[%s2088_s26 + $0xf8] sm:$0xff] %v277_v31   ;;  %v285_v33 = vld [vmem:[%s2083_s25 + $0x1e0] sm:$0xff]   ;;  %v289_v34 = vld [vmem:[%s2083_s25 + $0x1e8] sm:$0xff]  }
  0x23   : > { %282 = vst [vmem:[%s2088_s26 + $0x100] sm:$0xff] %v281_v32   ;;  %v293_v35 = vld [vmem:[%s2083_s25 + $0x1f0] sm:$0xff]   ;;  %286 = vst [vmem:[%s2088_s26 + $0x108] sm:$0xff] %v285_v33  }
  0x24   : > { %290 = vst [vmem:[%s2088_s26 + $0x110] sm:$0xff] %v289_v34   ;;  %294 = vst [vmem:[%s2088_s26 + $0x118] sm:$0xff] %v293_v35  }
  0x25 PF: > { %p1561_p5 = scmp.ge.s32.totalorder %s2024_s14, 1  ;;  %p462_p6 = scmp.lt.s32.totalorder %s2024_s14, 3 }
  0x27   : > { %p463_p7 = pnand %p1561_p5, %p462_p6 }
  0x28   : > { %v1964_v36 = vld [vmem:[%s2561_s1] sm:$0xff] (!%p463_p7)   ;;  %v2026_v37 = vmov (!%p463_p7), 0.0   ;;  %v1965_v38 = vld [vmem:[%s2561_s1 + $0x8] sm:$0x1f] (!%p463_p7)   ;;  %vm606_vm0 = vcmask (!%p463_p7), 1043456   ;;  %vm607_vm1 = vcmask (!%p463_p7), 1044480  }
  0x29   : > { %466 = sbr.rel (%p463_p7) target bundleno = 410 (0x19a), region = 69  ;;  %1775 = vmatprep.subr.bf16.mxu0 (!%p463_p7), %v2026_v37  ;;  %1815 = vmatprep.subr.bf16.mxu1 (!%p463_p7), %v2026_v37  ;;  %s469_s4 = sand.u32 (!%p463_p7), 1, %s2016_s12   ;;  %v2027_v39 = vmov (!%p463_p7), 65535   ;;  %vm2028_vm2 = vmmov (!%p463_p7), 0   ;;  %vm578_vm3 = vcmask (!%p463_p7), 203776   ;;  %vm1475_vm4 = vcmask (!%p463_p7), 76800  }
  0x2a   : > { %1776 = vmatpush3.bf16.msra.mxu0 (!%p463_p7), %v1964_v36  ;;  %1816 = vmatpush3.bf16.msra.mxu1 (!%p463_p7), %v1964_v36  ;;  %v608_v40 = vsel (!%p463_p7), %vm606_vm0, 4294967295, %v2027_v39  ;;  %s1936_s5 = smul.u32 (!%p463_p7), 288, %s469_s4 }
  0x2b   : > { %1777 = vmatprep.subr.bf16.mxu0 (!%p463_p7), %v2026_v37  ;;  %1817 = vmatprep.subr.bf16.mxu1 (!%p463_p7), %v2026_v37  ;;  %v609_v41 = vsel (!%p463_p7), %vm607_vm1, %v608_v40, 0  ;;  %s493_s7 = smul.u32 (!%p463_p7), 18, %s1556_s15 }
  0x2c   : > { %1779 = vmatprep.mubr.msk.bf16.mxu0 (!%p463_p7), %vm2028_vm2, %v2026_v37  ;;  %1819 = vmatprep.mubr.msk.bf16.mxu1 (!%p463_p7), %vm2028_vm2, %v2026_v37  ;;  %v611_v42 = vand.u32 (!%p463_p7), %v1965_v38, %v609_v41  ;;  %s2176_s6 = scalar_lea.vmem (!%p463_p7), [#allocation2], %s1936_s5 }
  0x2d   : > { %v1966_v43 = vld [vmem:[%s2176_s6] sm:$0xff] (!%p463_p7)   ;;  %v1967_v44 = vld [vmem:[%s2176_s6 + $0x48] sm:$0xff] (!%p463_p7)   ;;  %v1969_v46 = vld [vmem:[%s2176_s6 + $0x50] sm:$0xff] (!%p463_p7)   ;;  %p494_p8 = scmp.lt.s32.totalorder (!%p463_p7), %s493_s7, 35 }
  0x2e   : > { %1778 = vmatpush3.bf16.msra.mxu0 (!%p463_p7), %v611_v42  ;;  %1818 = vmatpush3.bf16.msra.mxu1 (!%p463_p7), %v611_v42  ;;  %v1968_v45 = vld [vmem:[%s2176_s6 + $0x8] sm:$0xff] (!%p463_p7)   ;;  %v1970_v47 = vld [vmem:[%s2176_s6 + $0x10] sm:$0xff] (!%p463_p7)   ;;  %v1971_v48 = vld [vmem:[%s2176_s6 + $0x58] sm:$0xff] (!%p463_p7)  }
  0x2f   : > { %1855 = vmatprep.subr.bf16.mxu0 (!%p463_p7), %v2026_v37  ;;  %1895 = vmatprep.subr.bf16.mxu1 (!%p463_p7), %v2026_v37  ;;  %v1972_v49 = vld [vmem:[%s2176_s6 + $0x18] sm:$0xff] (!%p463_p7)   ;;  %v1973_v50 = vld [vmem:[%s2176_s6 + $0x60] sm:$0xff] (!%p463_p7)   ;;  %v1975_v52 = vld [vmem:[%s2176_s6 + $0x68] sm:$0xff] (!%p463_p7)  }
  0x30   : > { %v1974_v51 = vld [vmem:[%s2176_s6 + $0x20] sm:$0xff]   ;;  %v1976_v53 = vld [vmem:[%s2176_s6 + $0x28] sm:$0xff]   ;;  %v1977_v54 = vld [vmem:[%s2176_s6 + $0x70] sm:$0xff]   ;;  %s2570_s7 = smov (!%p494_p8, %s493_s7), 35 }
  0x31   : > { %1780 = vmatmul.mubr.msk.bf16.vlgmr.msra.gmra.mrb[0].mxu0 %vm578_vm3, %v1966_v43  ;;  %1820 = vmatmul.mubr.msk.bf16.vlgmr.msra.gmra.mrb[0].mxu1 %vm578_vm3, %v1967_v44  ;;  %v1978_v55 = vld [vmem:[%s2176_s6 + $0x30] sm:$0xff]   ;;  %v1979_v56 = vld [vmem:[%s2176_s6 + $0x78] sm:$0xff]   ;;  %v1981_v58 = vld [vmem:[%s2176_s6 + $0x80] sm:$0xff]   ;;  %s1562_s10 = sshll.u32 %s2570_s7, 2 }
  0x32   : > { %1856 = vmatpush3.bf16.msra.mxu0 %v1964_v36  ;;  %1896 = vmatpush3.bf16.msra.mxu1 %v1964_v36  ;;  %v1980_v57 = vld [vmem:[%s2176_s6 + $0x38] sm:$0xff]   ;;  %v1982_v59 = vld [vmem:[%s2176_s6 + $0x40] sm:$0xff]   ;;  %v1983_v60 = vld [vmem:[%s2176_s6 + $0x88] sm:$0xff]   ;;  %s2448_s14 = scalar_lea.vmem %s2563_s3, %s1562_s10 }
  0x33   : > { %1783 = vmatprep.mubr.msk.bf16.mxu0 %vm2028_vm2, %v2026_v37  ;;  %1823 = vmatprep.mubr.msk.bf16.mxu1 %vm2028_vm2, %v2026_v37  ;;  %v1984_v61 = vld [vmem:[%s2176_s6 + $0x90] sm:$0xff]   ;;  %v1985_v62 = vld [vmem:[%s2176_s6 + $0xd8] sm:$0xff]   ;;  %v1987_v0 = vld [vmem:[%s2176_s6 + $0xe0] sm:$0xff]  }
  0x34   : > { %1857 = vmatprep.subr.bf16.mxu0 %v2026_v37  ;;  %1897 = vmatprep.subr.bf16.mxu1 %v2026_v37  ;;  %v1986_v63 = vld [vmem:[%s2176_s6 + $0x98] sm:$0xff]   ;;  %v1988_v1 = vld [vmem:[%s2176_s6 + $0xa0] sm:$0xff]   ;;  %v1989_v2 = vld [vmem:[%s2176_s6 + $0xe8] sm:$0xff]  }
  0x35   : > { %v1990_v3 = vld [vmem:[%s2176_s6 + $0xa8] sm:$0xff]   ;;  %v1991_v4 = vld [vmem:[%s2176_s6 + $0xf0] sm:$0xff]   ;;  %v1993_v6 = vld [vmem:[%s2176_s6 + $0xf8] sm:$0xff]  }
  0x36   : > { %1858 = vmatpush3.bf16.msra.mxu0 %v611_v42  ;;  %1898 = vmatpush3.bf16.msra.mxu1 %v611_v42  ;;  %v1992_v5 = vld [vmem:[%s2176_s6 + $0xb0] sm:$0xff]   ;;  %v1994_v7 = vld [vmem:[%s2176_s6 + $0xb8] sm:$0xff]   ;;  %v1995_v8 = vld [vmem:[%s2176_s6 + $0x100] sm:$0xff]  }
  0x37   : > { %v1996_v9 = vld [vmem:[%s2176_s6 + $0xc0] sm:$0xff]   ;;  %v1997_v10 = vld [vmem:[%s2176_s6 + $0x108] sm:$0xff]   ;;  %v1999_v12 = vld [vmem:[%s2176_s6 + $0x110] sm:$0xff]  }
  0x38   : > { %v1998_v11 = vld [vmem:[%s2176_s6 + $0xc8] sm:$0xff]   ;;  %v2000_v13 = vld [vmem:[%s2176_s6 + $0xd0] sm:$0xff]   ;;  %v2001_v14 = vld [vmem:[%s2176_s6 + $0x118] sm:$0xff]  }
  0x39   : > { %1784 = vmatmul.mubr.msk.bf16.gmra.mrb[4].mxu0 %vm578_vm3, %v1968_v45  ;;  %1824 = vmatmul.mubr.msk.bf16.gmra.mrb[4].mxu1 %vm578_vm3, %v1969_v46 }
  0x3a   : > { %1787 = vmatprep.mubr.msk.bf16.mxu0 %vm2028_vm2, %v2026_v37  ;;  %1827 = vmatprep.mubr.msk.bf16.mxu1 %vm2028_vm2, %v2026_v37 }
  0x41   : > { %1788 = vmatmul.mubr.msk.bf16.gmra.mrb[8].mxu0 %vm578_vm3, %v1970_v47  ;;  %1828 = vmatmul.mubr.msk.bf16.gmra.mrb[8].mxu1 %vm578_vm3, %v1971_v48 }
  0x42   : > { %1791 = vmatprep.mubr.msk.bf16.mxu0 %vm2028_vm2, %v2026_v37  ;;  %1831 = vmatprep.mubr.msk.bf16.mxu1 %vm2028_vm2, %v2026_v37 }
  0x49   : > { %1792 = vmatmul.mubr.msk.bf16.gmra.mrb[12].mxu0 %vm578_vm3, %v1972_v49  ;;  %1832 = vmatmul.mubr.msk.bf16.gmra.mrb[12].mxu1 %vm578_vm3, %v1973_v50 }
  0x4a   : > { %1795 = vmatprep.mubr.msk.bf16.mxu0 %vm2028_vm2, %v2026_v37  ;;  %1835 = vmatprep.mubr.msk.bf16.mxu1 %vm2028_vm2, %v2026_v37 }
  0x51   : > { %1796 = vmatmul.mubr.msk.bf16.gmra.mrb[16].mxu0 %vm578_vm3, %v1974_v51  ;;  %1836 = vmatmul.mubr.msk.bf16.gmra.mrb[16].mxu1 %vm578_vm3, %v1975_v52 }
  0x52   : > { %1799 = vmatprep.mubr.msk.bf16.mxu0 %vm2028_vm2, %v2026_v37  ;;  %1839 = vmatprep.mubr.msk.bf16.mxu1 %vm2028_vm2, %v2026_v37 }
  0x59   : > { %1800 = vmatmul.mubr.msk.bf16.gmra.mrb[20].mxu0 %vm578_vm3, %v1976_v53  ;;  %1840 = vmatmul.mubr.msk.bf16.gmra.mrb[20].mxu1 %vm578_vm3, %v1977_v54 }
  0x5a   : > { %1803 = vmatprep.mubr.msk.bf16.mxu0 %vm2028_vm2, %v2026_v37  ;;  %1843 = vmatprep.mubr.msk.bf16.mxu1 %vm2028_vm2, %v2026_v37 }
  0x61   : > { %1804 = vmatmul.mubr.msk.bf16.gmra.mrb[24].mxu0 %vm578_vm3, %v1978_v55  ;;  %1844 = vmatmul.mubr.msk.bf16.gmra.mrb[24].mxu1 %vm578_vm3, %v1979_v56 }
  0x62   : > { %1807 = vmatprep.mubr.msk.bf16.mxu0 %vm2028_vm2, %v2026_v37  ;;  %1847 = vmatprep.mubr.msk.bf16.mxu1 %vm2028_vm2, %v2026_v37 }
  0x69   : > { %1808 = vmatmul.mubr.msk.bf16.gmra.mrb[28].mxu0 %vm578_vm3, %v1980_v57  ;;  %1848 = vmatmul.mubr.msk.bf16.gmra.mrb[28].mxu1 %vm578_vm3, %v1981_v58 }
  0x6a   : > { %1811 = vmatprep.mubr.msk.bf16.mxu0 %vm2028_vm2, %v2026_v37  ;;  %1851 = vmatprep.mubr.msk.bf16.mxu1 %vm2028_vm2, %v2026_v37 }
  0x71   : > { %1812 = vmatmul.mubr.msk.bf16.gmra.mrb[32].mxu0 %vm578_vm3, %v1982_v59  ;;  %1852 = vmatmul.mubr.msk.bf16.gmra.mrb[32].mxu1 %vm578_vm3, %v1983_v60 }
  0x72   : > { %1859 = vmatprep.mubr.msk.bf16.mxu0 %vm2028_vm2, %v2026_v37  ;;  %1899 = vmatprep.mubr.msk.bf16.mxu1 %vm2028_vm2, %v2026_v37 }
  0x79   : > { %1860 = vmatmul.mubr.msk.bf16.vlgmr.msra.gmra.mrb[36].mxu0 %vm578_vm3, %v1984_v61  ;;  %1900 = vmatmul.mubr.msk.bf16.vlgmr.msra.gmra.mrb[36].mxu1 %vm578_vm3, %v1985_v62 }
  0x7a   : > { %1863 = vmatprep.mubr.msk.bf16.mxu0 %vm2028_vm2, %v2026_v37  ;;  %1903 = vmatprep.mubr.msk.bf16.mxu1 %vm2028_vm2, %v2026_v37 }
  0x81   : > { %1864 = vmatmul.mubr.msk.bf16.gmra.mrb[40].mxu0 %vm578_vm3, %v1986_v63  ;;  %1904 = vmatmul.mubr.msk.bf16.gmra.mrb[40].mxu1 %vm578_vm3, %v1987_v0 }
  0x82   : > { %1867 = vmatprep.mubr.msk.bf16.mxu0 %vm2028_vm2, %v2026_v37  ;;  %1907 = vmatprep.mubr.msk.bf16.mxu1 %vm2028_vm2, %v2026_v37 }
  0x89   : > { %1868 = vmatmul.mubr.msk.bf16.gmra.mrb[44].mxu0 %vm578_vm3, %v1988_v1  ;;  %1908 = vmatmul.mubr.msk.bf16.gmra.mrb[44].mxu1 %vm578_vm3, %v1989_v2 }
  0x8a   : > { %1871 = vmatprep.mubr.msk.bf16.mxu0 %vm2028_vm2, %v2026_v37  ;;  %1911 = vmatprep.mubr.msk.bf16.mxu1 %vm2028_vm2, %v2026_v37 }
  0x91   : > { %1872 = vmatmul.mubr.msk.bf16.gmra.mrb[48].mxu0 %vm578_vm3, %v1990_v3  ;;  %1912 = vmatmul.mubr.msk.bf16.gmra.mrb[48].mxu1 %vm578_vm3, %v1991_v4 }
  0x92   : > { %1875 = vmatprep.mubr.msk.bf16.mxu0 %vm2028_vm2, %v2026_v37  ;;  %1915 = vmatprep.mubr.msk.bf16.mxu1 %vm2028_vm2, %v2026_v37 }
  0x99   : > { %1876 = vmatmul.mubr.msk.bf16.gmra.mrb[52].mxu0 %vm578_vm3, %v1992_v5  ;;  %1916 = vmatmul.mubr.msk.bf16.gmra.mrb[52].mxu1 %vm578_vm3, %v1993_v6 }
  0x9a   : > { %1879 = vmatprep.mubr.msk.bf16.mxu0 %vm2028_vm2, %v2026_v37  ;;  %1919 = vmatprep.mubr.msk.bf16.mxu1 %vm2028_vm2, %v2026_v37 }
  0xa1   : > { %1880 = vmatmul.mubr.msk.bf16.gmra.mrb[56].mxu0 %vm578_vm3, %v1994_v7  ;;  %1920 = vmatmul.mubr.msk.bf16.gmra.mrb[56].mxu1 %vm578_vm3, %v1995_v8 }
  0xa2   : > { %1883 = vmatprep.mubr.msk.bf16.mxu0 %vm2028_vm2, %v2026_v37  ;;  %1923 = vmatprep.mubr.msk.bf16.mxu1 %vm2028_vm2, %v2026_v37 }
  0xa9   : > { %1884 = vmatmul.mubr.msk.bf16.gmra.mrb[60].mxu0 %vm578_vm3, %v1996_v9  ;;  %1924 = vmatmul.mubr.msk.bf16.gmra.mrb[60].mxu1 %vm578_vm3, %v1997_v10 }
  0xaa   : > { %1887 = vmatprep.mubr.msk.bf16.mxu0 %vm2028_vm2, %v2026_v37  ;;  %1927 = vmatprep.mubr.msk.bf16.mxu1 %vm2028_vm2, %v2026_v37 }
  0xb1   : > { %1888 = vmatmul.mubr.msk.bf16.gmra.mrb[64].mxu0 %vm578_vm3, %v1998_v11  ;;  %1928 = vmatmul.mubr.msk.bf16.gmra.mrb[64].mxu1 %vm578_vm3, %v1999_v12 }
  0xb2   : > { %1891 = vmatprep.mubr.msk.bf16.mxu0 %vm2028_vm2, %v2026_v37  ;;  %1931 = vmatprep.mubr.msk.bf16.mxu1 %vm2028_vm2, %v2026_v37 }
  0xb9   : > { %1892 = vmatmul.mubr.msk.bf16.gmra.mrb[68].mxu0 %vm578_vm3, %v2000_v13  ;;  %1932 = vmatmul.mubr.msk.bf16.gmra.mrb[68].mxu1 %vm578_vm3, %v2001_v14 }
 0x104   : > { %v2322_v15 = vpop.f32.mrb[0].mxu0  ;;  %v2324_v16 = vpop.f32.mrb[0].mxu1 }
 0x105   : > { %v914_v17 = vmax.f32 %v2322_v15, %v2324_v16  ;;  %v1781_v18 = vpop.f32.mrb[1].mxu0  ;;  %v1821_v19 = vpop.f32.mrb[1].mxu1 }
 0x106   : > { %v2328_v20 = vpop.f32.mrb[2].mxu0  ;;  %v2330_v21 = vpop.f32.mrb[2].mxu1 }
 0x107   : > { %v915_v22 = vmax.f32 %v2328_v20, %v2330_v21  ;;  %v1782_v23 = vpop.f32.mrb[3].mxu0  ;;  %v1822_v24 = vpop.f32.mrb[3].mxu1 }
 0x10c   : > { %v2334_v25 = vpop.f32.mrb[4].mxu0  ;;  %v2336_v26 = vpop.f32.mrb[4].mxu1 }
 0x10d   : > { %v916_v27 = vmax.f32 %v2334_v25, %v2336_v26  ;;  %v1785_v28 = vpop.f32.mrb[5].mxu0  ;;  %v1825_v29 = vpop.f32.mrb[5].mxu1 }
 0x10e   : > { %v2340_v30 = vpop.f32.mrb[6].mxu0  ;;  %v2342_v31 = vpop.f32.mrb[6].mxu1 }
 0x10f   : > { %v917_v32 = vmax.f32 %v2340_v30, %v2342_v31  ;;  %v1786_v33 = vpop.f32.mrb[7].mxu0  ;;  %v1826_v34 = vpop.f32.mrb[7].mxu1 }
 0x114   : > { %v2346_v35 = vpop.f32.mrb[8].mxu0  ;;  %v2348_v36 = vpop.f32.mrb[8].mxu1 }
 0x115   : > { %v918_v37 = vmax.f32 %v2346_v35, %v2348_v36  ;;  %v1789_v38 = vpop.f32.mrb[9].mxu0  ;;  %v1829_v39 = vpop.f32.mrb[9].mxu1 }
 0x116   : > { %v2352_v40 = vpop.f32.mrb[10].mxu0  ;;  %v2354_v41 = vpop.f32.mrb[10].mxu1 }
 0x117   : > { %v919_v42 = vmax.f32 %v2352_v40, %v2354_v41  ;;  %v1790_v43 = vpop.f32.mrb[11].mxu0  ;;  %v1830_v44 = vpop.f32.mrb[11].mxu1 }
 0x11c   : > { %v2358_v45 = vpop.f32.mrb[12].mxu0  ;;  %v2360_v46 = vpop.f32.mrb[12].mxu1 }
 0x11d   : > { %v920_v47 = vmax.f32 %v2358_v45, %v2360_v46  ;;  %v1793_v48 = vpop.f32.mrb[13].mxu0  ;;  %v1833_v49 = vpop.f32.mrb[13].mxu1 }
 0x11e   : > { %v2364_v50 = vpop.f32.mrb[14].mxu0  ;;  %v2366_v51 = vpop.f32.mrb[14].mxu1 }
 0x11f   : > { %v921_v52 = vmax.f32 %v2364_v50, %v2366_v51  ;;  %v1794_v53 = vpop.f32.mrb[15].mxu0  ;;  %v1834_v54 = vpop.f32.mrb[15].mxu1 }
 0x124   : > { %v2370_v55 = vpop.f32.mrb[16].mxu0  ;;  %v2372_v56 = vpop.f32.mrb[16].mxu1 }
 0x125   : > { %v922_v57 = vmax.f32 %v2370_v55, %v2372_v56  ;;  %v1797_v58 = vpop.f32.mrb[17].mxu0  ;;  %v1837_v59 = vpop.f32.mrb[17].mxu1 }
 0x126   : > { %v2376_v60 = vpop.f32.mrb[18].mxu0  ;;  %v2378_v61 = vpop.f32.mrb[18].mxu1 }
 0x127   : > { %v923_v62 = vmax.f32 %v2376_v60, %v2378_v61  ;;  %v1798_v63 = vpop.f32.mrb[19].mxu0  ;;  %v1838_v0 = vpop.f32.mrb[19].mxu1 }
 0x12c   : > { %v2382_v1 = vpop.f32.mrb[20].mxu0  ;;  %v2384_v2 = vpop.f32.mrb[20].mxu1 }
 0x12d   : > { %v924_v3 = vmax.f32 %v2382_v1, %v2384_v2  ;;  %v1801_v4 = vpop.f32.mrb[21].mxu0  ;;  %v1841_v5 = vpop.f32.mrb[21].mxu1 }
 0x12e   : > { %v2388_v6 = vpop.f32.mrb[22].mxu0  ;;  %v2390_v7 = vpop.f32.mrb[22].mxu1 }
 0x12f   : > { %v925_v8 = vmax.f32 %v2388_v6, %v2390_v7  ;;  %v1802_v9 = vpop.f32.mrb[23].mxu0  ;;  %v1842_v10 = vpop.f32.mrb[23].mxu1 }
 0x134   : > { %v2394_v11 = vpop.f32.mrb[24].mxu0  ;;  %v2396_v12 = vpop.f32.mrb[24].mxu1 }
 0x135   : > { %v926_v13 = vmax.f32 %v2394_v11, %v2396_v12  ;;  %v1805_v14 = vpop.f32.mrb[25].mxu0  ;;  %v1845_v18 = vpop.f32.mrb[25].mxu1 }
 0x136   : > { %v2400_v19 = vpop.f32.mrb[26].mxu0  ;;  %v2402_v23 = vpop.f32.mrb[26].mxu1 }
 0x137   : > { %v927_v24 = vmax.f32 %v2400_v19, %v2402_v23  ;;  %v1806_v28 = vpop.f32.mrb[27].mxu0  ;;  %v1846_v29 = vpop.f32.mrb[27].mxu1 }
 0x13c   : > { %v2406_v33 = vpop.f32.mrb[28].mxu0  ;;  %v2408_v34 = vpop.f32.mrb[28].mxu1 }
 0x13d   : > { %v928_v38 = vmax.f32 %v2406_v33, %v2408_v34  ;;  %v1809_v39 = vpop.f32.mrb[29].mxu0  ;;  %v1849_v43 = vpop.f32.mrb[29].mxu1 }
 0x13e   : > { %v2412_v44 = vpop.f32.mrb[30].mxu0  ;;  %v2414_v48 = vpop.f32.mrb[30].mxu1 }
 0x13f   : > { %v929_v49 = vmax.f32 %v2412_v44, %v2414_v48  ;;  %v1810_v53 = vpop.f32.mrb[31].mxu0  ;;  %v1850_v54 = vpop.f32.mrb[31].mxu1 }
 0x140   : > { %v2438_v54 = vld [vmem:[%s2562_s2] ss:$0 sm:$0xff] }
 0x144   : > { %v2418_v58 = vpop.f32.mrb[32].mxu0  ;;  %v2420_v59 = vpop.f32.mrb[32].mxu1 }
 0x145   : > { %v1813_v0 = vpop.f32.mrb[33].mxu0  ;;  %v1853_v4 = vpop.f32.mrb[33].mxu1  ;;  %v2564_v44 = vmax.f32 %v2418_v58, %v2420_v59 }
 0x146   : > { %v2426_v5 = vpop.f32.mrb[34].mxu0  ;;  %v2428_v9 = vpop.f32.mrb[34].mxu1 }
 0x147   : > { %v1814_v14 = vpop.f32.mrb[35].mxu0  ;;  %v1854_v18 = vpop.f32.mrb[35].mxu1 }
 0x14c   : > { %v1057_v28 = vpop.f32.mrb[36].mxu0  ;;  %v1271_v29 = vpop.f32.mrb[36].mxu1 }
 0x14d   : > { %v1128_v39 = vmax.f32 %v914_v17, %v1057_v28  ;;  %v1861_v43 = vpop.f32.mrb[37].mxu0  ;;  %v1901_v53 = vpop.f32.mrb[37].mxu1 }
 0x14e   : > { %v1060_v0 = vpop.f32.mrb[38].mxu0  ;;  %v1274_v4 = vpop.f32.mrb[38].mxu1 }
 0x14f   : > { %v1342_v10 = vmax.f32 %v1128_v39, %v1271_v29  ;;  %v1129_v14 = vmax.f32 %v915_v22, %v1060_v0  ;;  %v1862_v18 = vpop.f32.mrb[39].mxu0  ;;  %v1902_v63 = vpop.f32.mrb[39].mxu1 }
 0x151   : > { %v1367_v15 = vadd.f32 %v2438_v54, %v1342_v10  ;;  %v1343_v16 = vmax.f32 %v1129_v14, %v1274_v4 }
 0x153   : > { %v1385_v17 = vmax.f32 %v1367_v15, 0.0  ;;  %v1368_v28 = vadd.f32 %v2438_v54, %v1343_v16 }
 0x154   : > { %v1065_v29 = vpop.f32.mrb[40].mxu0  ;;  %v1279_v20 = vpop.f32.mrb[40].mxu1 }
 0x155   : > { %v1713_v21 = vpack.c.bf16 %v1385_v17, %v1385_v17  ;;  %v1386_v22 = vmax.f32 %v1368_v28, 0.0  ;;  %v1130_v63 = vmax.f32 %v916_v27, %v1065_v29  ;;  %v1865_v10 = vpop.f32.mrb[41].mxu0  ;;  %v1905_v39 = vpop.f32.mrb[41].mxu1 }
 0x156   : > { %v1068_v43 = vpop.f32.mrb[42].mxu0  ;;  %v1282_v53 = vpop.f32.mrb[42].mxu1 }
 0x157   : > { %1476 = vst.msk [vmem:[%s2448_s14] sm:$0xf] %vm1475_vm4, %v1713_v21  ;;  %v1714_v0 = vpack.c.bf16 %v1386_v22, %v1386_v22  ;;  %v1344_v4 = vmax.f32 %v1130_v63, %v1279_v20  ;;  %v1131_v14 = vmax.f32 %v917_v32, %v1068_v43  ;;  %v1866_v18 = vpop.f32.mrb[43].mxu0  ;;  %v1906_v15 = vpop.f32.mrb[43].mxu1 }
 0x159   : > { %1477 = vst.msk [vmem:[%s2448_s14 + $0x4] sm:$0xf] %vm1475_vm4, %v1714_v0  ;;  %v1369_v25 = vadd.f32 %v2438_v54, %v1344_v4  ;;  %v1345_v26 = vmax.f32 %v1131_v14, %v1282_v53 }
 0x15b   : > { %v1387_v27 = vmax.f32 %v1369_v25, 0.0  ;;  %v1370_v16 = vadd.f32 %v2438_v54, %v1345_v26 }
 0x15c   : > { %v1073_v17 = vpop.f32.mrb[44].mxu0  ;;  %v1287_v28 = vpop.f32.mrb[44].mxu1 }
 0x15d   : > { %v1715_v29 = vpack.c.bf16 %v1387_v27, %v1387_v27  ;;  %v1388_v20 = vmax.f32 %v1370_v16, 0.0  ;;  %v1132_v30 = vmax.f32 %v918_v37, %v1073_v17  ;;  %v1869_v31 = vpop.f32.mrb[45].mxu0  ;;  %v1909_v32 = vpop.f32.mrb[45].mxu1 }
 0x15e   : > { %v1076_v21 = vpop.f32.mrb[46].mxu0  ;;  %v1290_v22 = vpop.f32.mrb[46].mxu1 }
 0x15f   : > { %1478 = vst.msk [vmem:[%s2448_s14 + $0x8] sm:$0xf] %vm1475_vm4, %v1715_v29  ;;  %v1716_v63 = vpack.c.bf16 %v1388_v20, %v1388_v20  ;;  %v1346_v10 = vmax.f32 %v1132_v30, %v1287_v28  ;;  %v1133_v39 = vmax.f32 %v919_v42, %v1076_v21  ;;  %v1870_v43 = vpop.f32.mrb[47].mxu0  ;;  %v1910_v53 = vpop.f32.mrb[47].mxu1 }
 0x161   : > { %1479 = vst.msk [vmem:[%s2448_s14 + $0xc] sm:$0xf] %vm1475_vm4, %v1716_v63  ;;  %v1371_v35 = vadd.f32 %v2438_v54, %v1346_v10  ;;  %v1347_v36 = vmax.f32 %v1133_v39, %v1290_v22 }
 0x163   : > { %v1389_v37 = vmax.f32 %v1371_v35, 0.0  ;;  %v1372_v0 = vadd.f32 %v2438_v54, %v1347_v36 }
 0x164   : > { %v1081_v4 = vpop.f32.mrb[48].mxu0  ;;  %v1295_v14 = vpop.f32.mrb[48].mxu1 }
 0x165   : > { %v1717_v18 = vpack.c.bf16 %v1389_v37, %v1389_v37  ;;  %v1390_v15 = vmax.f32 %v1372_v0, 0.0  ;;  %v1134_v40 = vmax.f32 %v920_v47, %v1081_v4  ;;  %v1873_v41 = vpop.f32.mrb[49].mxu0  ;;  %v1913_v42 = vpop.f32.mrb[49].mxu1 }
 0x166   : > { %v1084_v25 = vpop.f32.mrb[50].mxu0  ;;  %v1298_v26 = vpop.f32.mrb[50].mxu1 }
 0x167   : > { %1480 = vst.msk [vmem:[%s2448_s14 + $0x10] sm:$0xf] %vm1475_vm4, %v1717_v18  ;;  %v1718_v27 = vpack.c.bf16 %v1390_v15, %v1390_v15  ;;  %v1348_v16 = vmax.f32 %v1134_v40, %v1295_v14  ;;  %v1135_v17 = vmax.f32 %v921_v52, %v1084_v25  ;;  %v1874_v28 = vpop.f32.mrb[51].mxu0  ;;  %v1914_v29 = vpop.f32.mrb[51].mxu1 }
 0x169   : > { %1481 = vst.msk [vmem:[%s2448_s14 + $0x14] sm:$0xf] %vm1475_vm4, %v1718_v27  ;;  %v1373_v45 = vadd.f32 %v2438_v54, %v1348_v16  ;;  %v1349_v46 = vmax.f32 %v1135_v17, %v1298_v26 }
 0x16b   : > { %v1391_v47 = vmax.f32 %v1373_v45, 0.0  ;;  %v1374_v20 = vadd.f32 %v2438_v54, %v1349_v46 }
 0x16c   : > { %v1089_v30 = vpop.f32.mrb[52].mxu0  ;;  %v1303_v31 = vpop.f32.mrb[52].mxu1 }
 0x16d   : > { %v1719_v32 = vpack.c.bf16 %v1391_v47, %v1391_v47  ;;  %v1392_v21 = vmax.f32 %v1374_v20, 0.0  ;;  %v1136_v50 = vmax.f32 %v922_v57, %v1089_v30  ;;  %v1877_v51 = vpop.f32.mrb[53].mxu0  ;;  %v1917_v52 = vpop.f32.mrb[53].mxu1 }
 0x16e   : > { %v1092_v22 = vpop.f32.mrb[54].mxu0  ;;  %v1306_v63 = vpop.f32.mrb[54].mxu1 }
 0x16f   : > { %1482 = vst.msk [vmem:[%s2448_s14 + $0x18] sm:$0xf] %vm1475_vm4, %v1719_v32  ;;  %v1720_v10 = vpack.c.bf16 %v1392_v21, %v1392_v21  ;;  %v1350_v39 = vmax.f32 %v1136_v50, %v1303_v31  ;;  %v1137_v43 = vmax.f32 %v923_v62, %v1092_v22  ;;  %v1878_v53 = vpop.f32.mrb[55].mxu0  ;;  %v1918_v35 = vpop.f32.mrb[55].mxu1 }
 0x171   : > { %1483 = vst.msk [vmem:[%s2448_s14 + $0x1c] sm:$0xf] %vm1475_vm4, %v1720_v10  ;;  %v1375_v55 = vadd.f32 %v2438_v54, %v1350_v39  ;;  %v1351_v56 = vmax.f32 %v1137_v43, %v1306_v63 }
 0x173   : > { %v1393_v57 = vmax.f32 %v1375_v55, 0.0  ;;  %v1376_v36 = vadd.f32 %v2438_v54, %v1351_v56 }
 0x174   : > { %v1097_v37 = vpop.f32.mrb[56].mxu0  ;;  %v1311_v0 = vpop.f32.mrb[56].mxu1 }
 0x175   : > { %v1721_v4 = vpack.c.bf16 %v1393_v57, %v1393_v57  ;;  %v1394_v14 = vmax.f32 %v1376_v36, 0.0  ;;  %v1138_v60 = vmax.f32 %v924_v3, %v1097_v37  ;;  %v1881_v61 = vpop.f32.mrb[57].mxu0  ;;  %v1921_v62 = vpop.f32.mrb[57].mxu1 }
 0x176   : > { %v1100_v18 = vpop.f32.mrb[58].mxu0  ;;  %v1314_v15 = vpop.f32.mrb[58].mxu1 }
 0x177   : > { %1484 = vst.msk [vmem:[%s2448_s14 + $0x20] sm:$0xf] %vm1475_vm4, %v1721_v4  ;;  %v1722_v40 = vpack.c.bf16 %v1394_v14, %v1394_v14  ;;  %v1352_v41 = vmax.f32 %v1138_v60, %v1311_v0  ;;  %v1139_v42 = vmax.f32 %v925_v8, %v1100_v18  ;;  %v1882_v25 = vpop.f32.mrb[59].mxu0  ;;  %v1922_v26 = vpop.f32.mrb[59].mxu1  ;;  %v2565_v18 = vmax.f32 %v2426_v5, %v2428_v9 }
 0x179   : > { %1485 = vst.msk [vmem:[%s2448_s14 + $0x24] sm:$0xf] %vm1475_vm4, %v1722_v40  ;;  %v1377_v1 = vadd.f32 %v2438_v54, %v1352_v41  ;;  %v1353_v2 = vmax.f32 %v1139_v42, %v1314_v15 }
 0x17b   : > { %v1395_v3 = vmax.f32 %v1377_v1, 0.0  ;;  %v1378_v27 = vadd.f32 %v2438_v54, %v1353_v2 }
 0x17c   : > { %v1105_v16 = vpop.f32.mrb[60].mxu0  ;;  %v1319_v17 = vpop.f32.mrb[60].mxu1 }
 0x17d   : > { %v1723_v28 = vpack.c.bf16 %v1395_v3, %v1395_v3  ;;  %v1396_v29 = vmax.f32 %v1378_v27, 0.0  ;;  %v1140_v6 = vmax.f32 %v926_v13, %v1105_v16  ;;  %v1885_v7 = vpop.f32.mrb[61].mxu0  ;;  %v1925_v8 = vpop.f32.mrb[61].mxu1 }
 0x17e   : > { %v1108_v45 = vpop.f32.mrb[62].mxu0  ;;  %v1322_v46 = vpop.f32.mrb[62].mxu1 }
 0x17f   : > { %1486 = vst.msk [vmem:[%s2448_s14 + $0x28] sm:$0xf] %vm1475_vm4, %v1723_v28  ;;  %v1724_v47 = vpack.c.bf16 %v1396_v29, %v1396_v29  ;;  %v1354_v20 = vmax.f32 %v1140_v6, %v1319_v17  ;;  %v1141_v30 = vmax.f32 %v927_v24, %v1108_v45  ;;  %v1886_v31 = vpop.f32.mrb[63].mxu0  ;;  %v1926_v32 = vpop.f32.mrb[63].mxu1 }
 0x181   : > { %1487 = vst.msk [vmem:[%s2448_s14 + $0x2c] sm:$0xf] %vm1475_vm4, %v1724_v47  ;;  %v1379_v11 = vadd.f32 %v2438_v54, %v1354_v20  ;;  %v1355_v12 = vmax.f32 %v1141_v30, %v1322_v46 }
 0x183   : > { %v1397_v13 = vmax.f32 %v1379_v11, 0.0  ;;  %v1380_v21 = vadd.f32 %v2438_v54, %v1355_v12 }
 0x184   : > { %v1113_v50 = vpop.f32.mrb[64].mxu0  ;;  %v1327_v51 = vpop.f32.mrb[64].mxu1 }
 0x185   : > { %v1725_v52 = vpack.c.bf16 %v1397_v13, %v1397_v13  ;;  %v1398_v22 = vmax.f32 %v1380_v21, 0.0  ;;  %v1142_v19 = vmax.f32 %v928_v38, %v1113_v50  ;;  %v1889_v23 = vpop.f32.mrb[65].mxu0  ;;  %v1929_v24 = vpop.f32.mrb[65].mxu1 }
 0x186   : > { %v1116_v63 = vpop.f32.mrb[66].mxu0  ;;  %v1330_v10 = vpop.f32.mrb[66].mxu1 }
 0x187   : > { %1488 = vst.msk [vmem:[%s2448_s14 + $0x30] sm:$0xf] %vm1475_vm4, %v1725_v52  ;;  %v1726_v39 = vpack.c.bf16 %v1398_v22, %v1398_v22  ;;  %v1356_v43 = vmax.f32 %v1142_v19, %v1327_v51  ;;  %v1143_v53 = vmax.f32 %v929_v49, %v1116_v63  ;;  %v1890_v35 = vpop.f32.mrb[67].mxu0  ;;  %v1930_v55 = vpop.f32.mrb[67].mxu1 }
 0x189   : > { %1489 = vst.msk [vmem:[%s2448_s14 + $0x34] sm:$0xf] %vm1475_vm4, %v1726_v39  ;;  %v1381_v33 = vadd.f32 %v2438_v54, %v1356_v43  ;;  %v1357_v34 = vmax.f32 %v1143_v53, %v1330_v10 }
 0x18b   : > { %v1399_v38 = vmax.f32 %v1381_v33, 0.0  ;;  %v1382_v56 = vadd.f32 %v2438_v54, %v1357_v34 }
 0x18c   : > { %v1121_v57 = vpop.f32.mrb[68].mxu0  ;;  %v1335_v36 = vpop.f32.mrb[68].mxu1 }
 0x18d   : > { %v1727_v37 = vpack.c.bf16 %v1399_v38, %v1399_v38  ;;  %v1400_v0 = vmax.f32 %v1382_v56, 0.0  ;;  %v1144_v48 = vmax.f32 %v2564_v44, %v1121_v57  ;;  %v1893_v49 = vpop.f32.mrb[69].mxu0  ;;  %v1933_v4 = vpop.f32.mrb[69].mxu1 }
 0x18e   : > { %v1124_v14 = vpop.f32.mrb[70].mxu0  ;;  %v1338_v60 = vpop.f32.mrb[70].mxu1 }
 0x18f   : > { %1490 = vst.msk [vmem:[%s2448_s14 + $0x38] sm:$0xf] %vm1475_vm4, %v1727_v37  ;;  %v1728_v61 = vpack.c.bf16 %v1400_v0, %v1400_v0  ;;  %v1358_v62 = vmax.f32 %v1144_v48, %v1335_v36  ;;  %v1145_v15 = vmax.f32 %v2565_v18, %v1124_v14  ;;  %v1894_v40 = vpop.f32.mrb[71].mxu0  ;;  %v1934_v41 = vpop.f32.mrb[71].mxu1 }
 0x191   : > { %1491 = vst.msk [vmem:[%s2448_s14 + $0x3c] sm:$0xf] %vm1475_vm4, %v1728_v61  ;;  %v1383_v58 = vadd.f32 %v2438_v54, %v1358_v62  ;;  %v1359_v59 = vmax.f32 %v1145_v15, %v1338_v60 }
 0x193   : > { %v1401_v42 = vmax.f32 %v1383_v58, 0.0  ;;  %v1384_v25 = vadd.f32 %v2438_v54, %v1359_v59 }
 0x195   : > { %v1729_v26 = vpack.c.bf16 %v1401_v42, %v1401_v42  ;;  %v1402_v1 = vmax.f32 %v1384_v25, 0.0 }
 0x197   : > { %1492 = vst.msk [vmem:[%s2448_s14 + $0x40] sm:$0xf] %vm1475_vm4, %v1729_v26  ;;  %v1730_v2 = vpack.c.bf16 %v1402_v1, %v1402_v1 }
 0x199   : > { %1493 = vst.msk [vmem:[%s2448_s14 + $0x44] sm:$0xf] %vm1475_vm4, %v1730_v2 }
 0x19a PF: > { %p10_p9 = scmp.ge.s32.totalorder %s2066_s16, 4   ;;  %s2566_s12 = smov %s2020_s13 }
 0x19b   : > { %s2567_s13 = smov %s2075_s19  ;;  %s2568_s14 = smov %s2066_s16 }
 0x19c   :  { %12 = sbr.rel (!%p10_p9) target bundleno = 2 (0x2), region = 111 }

// kernel: net_forward.3
= control target key start
LH: loop header
LB: loop body
LE: loop exit
PB: predicated region body
PF: predicated region fallthrough
CT: control target
= control target key end

     0   :  { %vm1039_vm0 = vcmask 1041408   ;;  %vm2932_vm1 = vmmov 0   ;;  %vm1035_vm2 = vcmask 162816   ;;  %vm2041_vm3 = vcmask 1040384   ;;  %s3669_s1 = inlined_call_operand.vmem [shape: bf16[256,20], index: 1, kind: input, shape index: {}]   ;;  %s3670_s0 = inlined_call_operand.vmem [shape: bf16[4,16,8,256], index: 0, kind: input, shape index: {}]   ;;  %s3671_s3 = inlined_call_operand.vmem [shape: bf16[16,20,50], index: 3, kind: input, shape index: {}]   ;;  %s3672_s2 = inlined_call_operand.vmem [shape: f32[1,20], index: 2, kind: input, shape index: {}]   ;;  %s3673_s5 = inlined_call_operand.vmem [shape: bf16[50,128], index: 5, kind: input, shape index: {}]   ;;  %s3674_s4 = inlined_call_operand.vmem [shape: f32[1,50], index: 4, kind: input, shape index: {}]   ;;  %s3675_s6 = inlined_call_operand.vmem [shape: f32[1,128], index: 6, kind: input, shape index: {}]   ;;  %s3676_s7 = inlined_call_operand.vmem [shape: f32[8,128], index: 7, kind: output, shape index: {}]  }
   0x1   :  { %v2779_v0 = vld [vmem:[%s3669_s1 + $0x40] sm:$0xff]   ;;  %v2781_v2 = vld [vmem:[%s3669_s1 + $0x48] sm:$0xff]   ;;  %v2988_v4 = vld [vmem:[%s3669_s1 + $0x50] sm:$0xff]   ;;  %vm2037_vm4 = vcmask 408576  }
   0x2   :  { %v2780_v1 = vld [vmem:[%s3669_s1] sm:$0xff]   ;;  %2328 = vmatprep.subr.bf16.mxu0 %v2779_v0  ;;  %2392 = vmatprep.subr.bf16.mxu1 %v2779_v0  ;;  %v2782_v3 = vld [vmem:[%s3669_s1 + $0x8] sm:$0xff]   ;;  %v2993_v5 = vld [vmem:[%s3669_s1 + $0x10] sm:$0xff]  }
   0x3   :  { %2329 = vmatpush3.bf16.msra.mxu0 %v2780_v1  ;;  %2393 = vmatpush3.bf16.msra.mxu1 %v2780_v1  ;;  %v3000_v6 = vld [vmem:[%s3669_s1 + $0x58] sm:$0xff]   ;;  %v3014_v8 = vld [vmem:[%s3669_s1 + $0x60] sm:$0xff]   ;;  %v3028_v10 = vld [vmem:[%s3669_s1 + $0x68] sm:$0xff]  }
   0x4   :  { %2330 = vmatprep.subr.bf16.mxu0 %v2781_v2  ;;  %2394 = vmatprep.subr.bf16.mxu1 %v2781_v2  ;;  %v3007_v7 = vld [vmem:[%s3669_s1 + $0x18] sm:$0xff]   ;;  %v3021_v9 = vld [vmem:[%s3669_s1 + $0x20] sm:$0xff]   ;;  %v3041_v13 = vld [vmem:[%s3669_s1 + $0x28] sm:$0xff]  }
   0x5   :  { %v2797_v11 = vld [vmem:[%s3670_s0 + $0x4] ss:$8 sps:$4 sm:$0xff]   ;;  %v3048_v14 = vld [vmem:[%s3669_s1 + $0x70] sm:$0xff]   ;;  %v3062_v16 = vld [vmem:[%s3669_s1 + $0x78] sm:$0xff]  }
   0x6   :  { %v2800_v12 = vld [vmem:[%s3670_s0 + $0x84] ss:$8 sps:$4 sm:$0xff]   ;;  %283 = vmatprep.mubr.bf16.mxu0 %v2797_v11  ;;  %v3055_v15 = vld [vmem:[%s3669_s1 + $0x30] sm:$0xff]   ;;  %v3069_v17 = vld [vmem:[%s3669_s1 + $0x38] sm:$0xff]  }
   0x7   :  { %2331 = vmatpush3.bf16.msra.mxu0 %v2782_v3  ;;  %2395 = vmatpush3.bf16.msra.mxu1 %v2782_v3  ;;  %v2795_v18 = vld [vmem:[%s3670_s0] ss:$8 sps:$4 sm:$0xff]   ;;  %v2801_v20 = vld [vmem:[%s3670_s0 + $0x14] ss:$8 sps:$4 sm:$0xff]   ;;  %v2805_v22 = vld [vmem:[%s3670_s0 + $0x10] ss:$8 sps:$4 sm:$0xff]  }
   0x8   :  { %2332 = vmatprep.subr.bf16.mxu0 %v2988_v4  ;;  %2396 = vmatprep.subr.bf16.mxu1 %v2988_v4  ;;  %v2798_v19 = vld [vmem:[%s3670_s0 + $0x80] ss:$8 sps:$4 sm:$0xff]   ;;  %v2803_v21 = vld [vmem:[%s3670_s0 + $0x94] ss:$8 sps:$4 sm:$0xff]   ;;  %v2806_v23 = vld [vmem:[%s3670_s0 + $0x90] ss:$8 sps:$4 sm:$0xff]  }
   0x9   :  { %477 = vmatprep.mubr.bf16.mxu1 %v2800_v12  ;;  %v2807_v24 = vld [vmem:[%s3670_s0 + $0x24] ss:$8 sps:$4 sm:$0xff]   ;;  %v2811_v26 = vld [vmem:[%s3670_s0 + $0x20] ss:$8 sps:$4 sm:$0xff]   ;;  %v2813_v28 = vld [vmem:[%s3670_s0 + $0x34] ss:$8 sps:$4 sm:$0xff]  }
   0xa   :  { %v2809_v25 = vld [vmem:[%s3670_s0 + $0xa4] ss:$8 sps:$4 sm:$0xff]   ;;  %v2812_v27 = vld [vmem:[%s3670_s0 + $0xa0] ss:$8 sps:$4 sm:$0xff]   ;;  %v2815_v29 = vld [vmem:[%s3670_s0 + $0xb4] ss:$8 sps:$4 sm:$0xff]  }
   0xb   :  { %2333 = vmatpush3.bf16.msra.mxu0 %v2993_v5  ;;  %2397 = vmatpush3.bf16.msra.mxu1 %v2993_v5  ;;  %v2817_v30 = vld [vmem:[%s3670_s0 + $0x30] ss:$8 sps:$4 sm:$0xff]   ;;  %v2819_v32 = vld [vmem:[%s3670_s0 + $0x44] ss:$8 sps:$4 sm:$0xff]   ;;  %v2823_v34 = vld [vmem:[%s3670_s0 + $0x40] ss:$8 sps:$4 sm:$0xff]  }
   0xc   :  { %2334 = vmatprep.subr.bf16.mxu0 %v3000_v6  ;;  %2398 = vmatprep.subr.bf16.mxu1 %v3000_v6  ;;  %v2818_v31 = vld [vmem:[%s3670_s0 + $0xb0] ss:$8 sps:$4 sm:$0xff]   ;;  %v2821_v33 = vld [vmem:[%s3670_s0 + $0xc4] ss:$8 sps:$4 sm:$0xff]   ;;  %v2824_v35 = vld [vmem:[%s3670_s0 + $0xc0] ss:$8 sps:$4 sm:$0xff]  }
   0xd   :  { %v2825_v36 = vld [vmem:[%s3670_s0 + $0x54] ss:$8 sps:$4 sm:$0xff]   ;;  %v2829_v38 = vld [vmem:[%s3670_s0 + $0x50] ss:$8 sps:$4 sm:$0xff]   ;;  %v2831_v40 = vld [vmem:[%s3670_s0 + $0x64] ss:$8 sps:$4 sm:$0xff]  }
   0xe   :  { %v2827_v37 = vld [vmem:[%s3670_s0 + $0xd4] ss:$8 sps:$4 sm:$0xff]   ;;  %v2830_v39 = vld [vmem:[%s3670_s0 + $0xd0] ss:$8 sps:$4 sm:$0xff]   ;;  %v2833_v41 = vld [vmem:[%s3670_s0 + $0xe4] ss:$8 sps:$4 sm:$0xff]  }
   0xf   :  { %2335 = vmatpush3.bf16.msra.mxu0 %v3007_v7  ;;  %2399 = vmatpush3.bf16.msra.mxu1 %v3007_v7  ;;  %v2835_v42 = vld [vmem:[%s3670_s0 + $0x60] ss:$8 sps:$4 sm:$0xff]   ;;  %v2837_v44 = vld [vmem:[%s3670_s0 + $0x74] ss:$8 sps:$4 sm:$0xff]   ;;  %v2841_v46 = vld [vmem:[%s3670_s0 + $0x70] ss:$8 sps:$4 sm:$0xff]  }
  0x10   :  { %2336 = vmatprep.subr.bf16.mxu0 %v3014_v8  ;;  %2400 = vmatprep.subr.bf16.mxu1 %v3014_v8  ;;  %v2836_v43 = vld [vmem:[%s3670_s0 + $0xe0] ss:$8 sps:$4 sm:$0xff]   ;;  %v2839_v45 = vld [vmem:[%s3670_s0 + $0xf4] ss:$8 sps:$4 sm:$0xff]   ;;  %v2842_v47 = vld [vmem:[%s3670_s0 + $0xf0] ss:$8 sps:$4 sm:$0xff]  }
  0x11   :  { %v2845_v48 = vld [vmem:[%s3670_s0 + $0x104] ss:$8 sps:$4 sm:$0xff]   ;;  %v2843_v50 = vld [vmem:[%s3670_s0 + $0x100] ss:$8 sps:$4 sm:$0xff]   ;;  %v2849_v52 = vld [vmem:[%s3670_s0 + $0x114] ss:$8 sps:$4 sm:$0xff]  }
  0x12   :  { %v2848_v49 = vld [vmem:[%s3670_s0 + $0x184] ss:$8 sps:$4 sm:$0xff]   ;;  %v2846_v51 = vld [vmem:[%s3670_s0 + $0x180] ss:$8 sps:$4 sm:$0xff]   ;;  %v2852_v53 = vld [vmem:[%s3670_s0 + $0x194] ss:$8 sps:$4 sm:$0xff]  }
  0x13   :  { %2337 = vmatpush3.bf16.msra.mxu0 %v3021_v9  ;;  %2401 = vmatpush3.bf16.msra.mxu1 %v3021_v9  ;;  %v2851_v54 = vld [vmem:[%s3670_s0 + $0x110] ss:$8 sps:$4 sm:$0xff]   ;;  %v2855_v56 = vld [vmem:[%s3670_s0 + $0x124] ss:$8 sps:$4 sm:$0xff]   ;;  %v2857_v58 = vld [vmem:[%s3670_s0 + $0x120] ss:$8 sps:$4 sm:$0xff]  }
  0x14   :  { %2338 = vmatprep.subr.bf16.mxu0 %v3028_v10  ;;  %2402 = vmatprep.subr.bf16.mxu1 %v3028_v10  ;;  %v2854_v55 = vld [vmem:[%s3670_s0 + $0x190] ss:$8 sps:$4 sm:$0xff]   ;;  %v2858_v57 = vld [vmem:[%s3670_s0 + $0x1a4] ss:$8 sps:$4 sm:$0xff]   ;;  %v2860_v59 = vld [vmem:[%s3670_s0 + $0x1a0] ss:$8 sps:$4 sm:$0xff]  }
  0x15   :  { %v2861_v60 = vld [vmem:[%s3670_s0 + $0x134] ss:$8 sps:$4 sm:$0xff]   ;;  %v2863_v62 = vld [vmem:[%s3670_s0 + $0x130] ss:$8 sps:$4 sm:$0xff]   ;;  %v2881_v12 = vld [vmem:[%s3670_s0 + $0x160] ss:$8 sps:$4 sm:$0xff]  }
  0x16   :  { %v2864_v61 = vld [vmem:[%s3670_s0 + $0x1b4] ss:$8 sps:$4 sm:$0xff]   ;;  %v2866_v63 = vld [vmem:[%s3670_s0 + $0x1b0] ss:$8 sps:$4 sm:$0xff]  }
  0x17   :  { %2339 = vmatpush3.bf16.msra.mxu0 %v3041_v13  ;;  %2403 = vmatpush3.bf16.msra.mxu1 %v3041_v13  ;;  %v2891_v11 = vld [vmem:[%s3671_s3 + $0xc] sm:$0xff]  }
  0x18   :  { %2340 = vmatprep.subr.bf16.mxu0 %v3048_v14  ;;  %2404 = vmatprep.subr.bf16.mxu1 %v3048_v14 }
  0x1b   :  { %2341 = vmatpush3.bf16.msra.mxu0 %v3055_v15  ;;  %2405 = vmatpush3.bf16.msra.mxu1 %v3055_v15 }
  0x1c   :  { %2342 = vmatprep.subr.bf16.mxu0 %v3062_v16  ;;  %2406 = vmatprep.subr.bf16.mxu1 %v3062_v16 }
  0x1f   :  { %2343 = vmatpush3.bf16.msra.mxu0 %v3069_v17  ;;  %2407 = vmatpush3.bf16.msra.mxu1 %v3069_v17 }
  0x20   :  { %2456 = vmatprep.subr.bf16.mxu0 %v2779_v0  ;;  %2520 = vmatprep.subr.bf16.mxu1 %v2779_v0  ;;  %v2867_v0 = vld [vmem:[%s3670_s0 + $0x144] ss:$8 sps:$4 sm:$0xff]  }
  0x22   :  { %284 = vmatmul.mubr.bf16.vlgmr.msra.gmra.mrb[0].mxu0 %v2795_v18  ;;  %478 = vmatmul.mubr.bf16.vlgmr.msra.gmra.mrb[0].mxu1 %v2798_v19  ;;  %v2890_v18 = vld [vmem:[%s3670_s0 + $0x1f0] ss:$8 sps:$4 sm:$0xff]   ;;  %v2893_v19 = vld [vmem:[%s3671_s3 + $0x14] ss:$0 sps:$4 sm:$0x33]  }
  0x23   :  { %2457 = vmatpush3.bf16.msra.mxu0 %v2780_v1  ;;  %2521 = vmatpush3.bf16.msra.mxu1 %v2780_v1  ;;  %v2870_v1 = vld [vmem:[%s3670_s0 + $0x1c4] ss:$8 sps:$4 sm:$0xff]  }
  0x24   :  { %291 = vmatprep.mubr.bf16.mxu0 %v2801_v20  ;;  %485 = vmatprep.mubr.bf16.mxu1 %v2803_v21  ;;  %v1041_v20 = vsel %vm1039_vm0, %v2893_v19, 0  ;;  %v2894_v21 = vld [vmem:[%s3671_s3 + $0x20] ss:$0 sps:$4 sm:$0x33]  }
  0x25   :  { %2458 = vmatprep.subr.bf16.mxu0 %v2781_v2  ;;  %2522 = vmatprep.subr.bf16.mxu1 %v2781_v2  ;;  %v2869_v2 = vld [vmem:[%s3670_s0 + $0x140] ss:$8 sps:$4 sm:$0xff]  }
  0x27   :  { %2459 = vmatpush3.bf16.msra.mxu0 %v2782_v3  ;;  %2523 = vmatpush3.bf16.msra.mxu1 %v2782_v3  ;;  %v2872_v3 = vld [vmem:[%s3670_s0 + $0x1c0] ss:$8 sps:$4 sm:$0xff]  }
  0x28   :  { %2460 = vmatprep.subr.bf16.mxu0 %v2988_v4  ;;  %2524 = vmatprep.subr.bf16.mxu1 %v2988_v4  ;;  %v2873_v4 = vld [vmem:[%s3670_s0 + $0x154] ss:$8 sps:$4 sm:$0xff]  }
  0x2a   :  { %292 = vmatmul.mubr.bf16.gmra.mrb[4].mxu0 %v2805_v22  ;;  %486 = vmatmul.mubr.bf16.gmra.mrb[4].mxu1 %v2806_v23  ;;  %v1156_v22 = vsel %vm1039_vm0, %v2894_v21, 0 }
  0x2b   :  { %299 = vmatprep.mubr.bf16.mxu0 %v2807_v24  ;;  %493 = vmatprep.mubr.bf16.mxu1 %v2809_v25 }
  0x2c   :  { %2461 = vmatpush3.bf16.msra.mxu0 %v2993_v5  ;;  %2525 = vmatpush3.bf16.msra.mxu1 %v2993_v5  ;;  %v2876_v5 = vld [vmem:[%s3670_s0 + $0x1d4] ss:$8 sps:$4 sm:$0xff]  }
  0x2d   :  { %2462 = vmatprep.subr.bf16.mxu0 %v3000_v6  ;;  %2526 = vmatprep.subr.bf16.mxu1 %v3000_v6  ;;  %v2875_v6 = vld [vmem:[%s3670_s0 + $0x150] ss:$8 sps:$4 sm:$0xff]  }
  0x30   :  { %2463 = vmatpush3.bf16.msra.mxu0 %v3007_v7  ;;  %2527 = vmatpush3.bf16.msra.mxu1 %v3007_v7  ;;  %v2878_v7 = vld [vmem:[%s3670_s0 + $0x1d0] ss:$8 sps:$4 sm:$0xff]  }
  0x31   :  { %2464 = vmatprep.subr.bf16.mxu0 %v3014_v8  ;;  %2528 = vmatprep.subr.bf16.mxu1 %v3014_v8  ;;  %v2931_v8 = vmov 0.0  }
  0x32   :  { %300 = vmatmul.mubr.bf16.gmra.mrb[8].mxu0 %v2811_v26  ;;  %494 = vmatmul.mubr.bf16.gmra.mrb[8].mxu1 %v2812_v27 }
  0x33   :  { %307 = vmatprep.mubr.bf16.mxu0 %v2813_v28  ;;  %501 = vmatprep.mubr.bf16.mxu1 %v2815_v29 }
  0x34   :  { %2465 = vmatpush3.bf16.msra.mxu0 %v3021_v9  ;;  %2529 = vmatpush3.bf16.msra.mxu1 %v3021_v9  ;;  %v2879_v9 = vld [vmem:[%s3670_s0 + $0x164] ss:$8 sps:$4 sm:$0xff]  }
  0x35   :  { %2466 = vmatprep.subr.bf16.mxu0 %v3028_v10  ;;  %2530 = vmatprep.subr.bf16.mxu1 %v3028_v10  ;;  %v2882_v10 = vld [vmem:[%s3670_s0 + $0x1e4] ss:$8 sps:$4 sm:$0xff]  }
  0x38   :  { %2467 = vmatpush3.bf16.msra.mxu0 %v3041_v13  ;;  %2531 = vmatpush3.bf16.msra.mxu1 %v3041_v13  ;;  %v2884_v13 = vld [vmem:[%s3670_s0 + $0x1e0] ss:$8 sps:$4 sm:$0xff]  }
  0x39   :  { %2468 = vmatprep.subr.bf16.mxu0 %v3048_v14  ;;  %2532 = vmatprep.subr.bf16.mxu1 %v3048_v14  ;;  %v2885_v14 = vld [vmem:[%s3670_s0 + $0x174] ss:$8 sps:$4 sm:$0xff]  }
  0x3a   :  { %308 = vmatmul.mubr.bf16.gmra.mrb[12].mxu0 %v2817_v30  ;;  %502 = vmatmul.mubr.bf16.gmra.mrb[12].mxu1 %v2818_v31 }
  0x3b   :  { %315 = vmatprep.mubr.bf16.mxu0 %v2819_v32  ;;  %509 = vmatprep.mubr.bf16.mxu1 %v2821_v33 }
  0x3c   :  { %2469 = vmatpush3.bf16.msra.mxu0 %v3055_v15  ;;  %2533 = vmatpush3.bf16.msra.mxu1 %v3055_v15  ;;  %v2888_v15 = vld [vmem:[%s3670_s0 + $0x1f4] ss:$8 sps:$4 sm:$0xff]  }
  0x3d   :  { %2470 = vmatprep.subr.bf16.mxu0 %v3062_v16  ;;  %2534 = vmatprep.subr.bf16.mxu1 %v3062_v16  ;;  %v2892_v16 = vld [vmem:[%s3671_s3 + $0x18] sm:$0xff]  }
  0x40   :  { %2471 = vmatpush3.bf16.msra.mxu0 %v3069_v17  ;;  %2535 = vmatpush3.bf16.msra.mxu1 %v3069_v17  ;;  %v2887_v17 = vld [vmem:[%s3670_s0 + $0x170] ss:$8 sps:$4 sm:$0xff]  }
  0x41   :  { %2637 = vmatprep.subr.bf16.mxu1 %v2931_v8  ;;  %2653 = vmatprep.subr.bf16.mxu0 %v2931_v8 }
  0x42   :  { %316 = vmatmul.mubr.bf16.gmra.mrb[16].mxu0 %v2823_v34  ;;  %510 = vmatmul.mubr.bf16.gmra.mrb[16].mxu1 %v2824_v35 }
  0x43   :  { %323 = vmatprep.mubr.bf16.mxu0 %v2825_v36  ;;  %517 = vmatprep.mubr.bf16.mxu1 %v2827_v37 }
  0x4a   :  { %324 = vmatmul.mubr.bf16.gmra.mrb[20].mxu0 %v2829_v38  ;;  %518 = vmatmul.mubr.bf16.gmra.mrb[20].mxu1 %v2830_v39 }
  0x4b   :  { %331 = vmatprep.mubr.bf16.mxu0 %v2831_v40  ;;  %525 = vmatprep.mubr.bf16.mxu1 %v2833_v41 }
  0x52   :  { %332 = vmatmul.mubr.bf16.gmra.mrb[24].mxu0 %v2835_v42  ;;  %526 = vmatmul.mubr.bf16.gmra.mrb[24].mxu1 %v2836_v43 }
  0x53   :  { %339 = vmatprep.mubr.bf16.mxu0 %v2837_v44  ;;  %533 = vmatprep.mubr.bf16.mxu1 %v2839_v45 }
  0x5a   :  { %340 = vmatmul.mubr.bf16.gmra.mrb[28].mxu0 %v2841_v46  ;;  %534 = vmatmul.mubr.bf16.gmra.mrb[28].mxu1 %v2842_v47 }
  0x5b   :  { %687 = vmatprep.mubr.bf16.mxu0 %v2845_v48  ;;  %897 = vmatprep.mubr.bf16.mxu1 %v2848_v49 }
  0x62   :  { %688 = vmatmul.mubr.bf16.vlgmr.msra.gmra.mrb[32].mxu0 %v2843_v50  ;;  %898 = vmatmul.mubr.bf16.vlgmr.msra.gmra.mrb[32].mxu1 %v2846_v51 }
  0x63   :  { %695 = vmatprep.mubr.bf16.mxu0 %v2849_v52  ;;  %905 = vmatprep.mubr.bf16.mxu1 %v2852_v53 }
  0x64   :  { %2638 = vmatpush3.bf16.msra.mxu1 %v2891_v11  ;;  %2654 = vmatpush3.bf16.msra.mxu0 %v2892_v16 }
  0x65   :  { %2639 = vmatprep.subr.bf16.mxu1 %v2931_v8  ;;  %2655 = vmatprep.subr.bf16.mxu0 %v2931_v8 }
  0x68   :  { %2640 = vmatpush3.bf16.msra.mxu1 %v1041_v20  ;;  %2656 = vmatpush3.bf16.msra.mxu0 %v1156_v22 }
  0x69   :  { %2645 = vmatprep.subr.bf16.mxu1 %v2931_v8  ;;  %2669 = vmatprep.subr.bf16.mxu0 %v2931_v8 }
  0x6a   :  { %696 = vmatmul.mubr.bf16.gmra.mrb[36].mxu0 %v2851_v54  ;;  %906 = vmatmul.mubr.bf16.gmra.mrb[36].mxu1 %v2854_v55 }
  0x6b   :  { %703 = vmatprep.mubr.bf16.mxu0 %v2855_v56  ;;  %913 = vmatprep.mubr.bf16.mxu1 %v2858_v57 }
  0x72   :  { %704 = vmatmul.mubr.bf16.gmra.mrb[40].mxu0 %v2857_v58  ;;  %914 = vmatmul.mubr.bf16.gmra.mrb[40].mxu1 %v2860_v59 }
  0x73   :  { %711 = vmatprep.mubr.bf16.mxu0 %v2861_v60  ;;  %921 = vmatprep.mubr.bf16.mxu1 %v2864_v61 }
  0x7a   :  { %712 = vmatmul.mubr.bf16.gmra.mrb[44].mxu0 %v2863_v62  ;;  %922 = vmatmul.mubr.bf16.gmra.mrb[44].mxu1 %v2866_v63 }
  0x7b   :  { %719 = vmatprep.mubr.bf16.mxu0 %v2867_v0  ;;  %929 = vmatprep.mubr.bf16.mxu1 %v2870_v1 }
  0x82   :  { %720 = vmatmul.mubr.bf16.gmra.mrb[48].mxu0 %v2869_v2  ;;  %930 = vmatmul.mubr.bf16.gmra.mrb[48].mxu1 %v2872_v3 }
  0x83   :  { %727 = vmatprep.mubr.bf16.mxu0 %v2873_v4  ;;  %937 = vmatprep.mubr.bf16.mxu1 %v2876_v5 }
  0x8a   :  { %728 = vmatmul.mubr.bf16.gmra.mrb[52].mxu0 %v2875_v6  ;;  %938 = vmatmul.mubr.bf16.gmra.mrb[52].mxu1 %v2878_v7 }
  0x8b   :  { %735 = vmatprep.mubr.bf16.mxu0 %v2879_v9  ;;  %945 = vmatprep.mubr.bf16.mxu1 %v2882_v10 }
  0x92   :  { %736 = vmatmul.mubr.bf16.gmra.mrb[56].mxu0 %v2881_v12  ;;  %946 = vmatmul.mubr.bf16.gmra.mrb[56].mxu1 %v2884_v13 }
  0x93   :  { %743 = vmatprep.mubr.bf16.mxu0 %v2885_v14  ;;  %953 = vmatprep.mubr.bf16.mxu1 %v2888_v15 }
  0x9a   :  { %744 = vmatmul.mubr.bf16.gmra.mrb[60].mxu0 %v2887_v17  ;;  %954 = vmatmul.mubr.bf16.gmra.mrb[60].mxu1 %v2890_v18 }
  0x9b   :  { %2641 = vmatprep.mubr.msk.bf16.mxu1 %vm2932_vm1, %v2931_v8  ;;  %2657 = vmatprep.mubr.msk.bf16.mxu0 %vm2932_vm1, %v2931_v8 }
  0xf5   :  { %v2344_v23 = vpop.f32.mrb[0].mxu0  ;;  %v2408_v24 = vpop.f32.mrb[0].mxu1 }
  0xf6   :  { %v2345_v25 = vpop.f32.mrb[1].mxu0  ;;  %v2409_v26 = vpop.f32.mrb[1].mxu1 }
  0xf7   :  { %v3309_v27 = vadd.f32 %v2345_v25, %v2344_v23  ;;  %v3311_v28 = vadd.f32 %v2409_v26, %v2408_v24  ;;  %v2347_v29 = vpop.f32.mrb[2].mxu0  ;;  %v2411_v30 = vpop.f32.mrb[2].mxu1 }
  0xf8   :  { %v2348_v31 = vpop.f32.mrb[3].mxu0  ;;  %v2412_v32 = vpop.f32.mrb[3].mxu1 }
  0xf9   :  { %v542_v33 = vmax.f32 %v3309_v27, %v3311_v28  ;;  %v3315_v34 = vadd.f32 %v2348_v31, %v2347_v29  ;;  %v3317_v35 = vadd.f32 %v2412_v32, %v2411_v30 }
  0xfb   :  { %v543_v36 = vmax.f32 %v3315_v34, %v3317_v35 }
  0xfd   :  { %v2350_v37 = vpop.f32.mrb[4].mxu0  ;;  %v2414_v38 = vpop.f32.mrb[4].mxu1 }
  0xfe   :  { %v2351_v39 = vpop.f32.mrb[5].mxu0  ;;  %v2415_v40 = vpop.f32.mrb[5].mxu1 }
  0xff   :  { %v3321_v41 = vadd.f32 %v2351_v39, %v2350_v37  ;;  %v3323_v42 = vadd.f32 %v2415_v40, %v2414_v38  ;;  %v2353_v43 = vpop.f32.mrb[6].mxu0  ;;  %v2417_v44 = vpop.f32.mrb[6].mxu1 }
 0x100   :  { %v2354_v45 = vpop.f32.mrb[7].mxu0  ;;  %v2418_v46 = vpop.f32.mrb[7].mxu1 }
 0x101   :  { %v544_v47 = vmax.f32 %v3321_v41, %v3323_v42  ;;  %v3327_v48 = vadd.f32 %v2354_v45, %v2353_v43  ;;  %v3329_v49 = vadd.f32 %v2418_v46, %v2417_v44 }
 0x103   :  { %v545_v50 = vmax.f32 %v3327_v48, %v3329_v49 }
 0x105   :  { %v2356_v51 = vpop.f32.mrb[8].mxu0  ;;  %v2420_v52 = vpop.f32.mrb[8].mxu1 }
 0x106   :  { %v2357_v53 = vpop.f32.mrb[9].mxu0  ;;  %v2421_v54 = vpop.f32.mrb[9].mxu1 }
 0x107   :  { %v3333_v55 = vadd.f32 %v2357_v53, %v2356_v51  ;;  %v3335_v56 = vadd.f32 %v2421_v54, %v2420_v52  ;;  %v2359_v57 = vpop.f32.mrb[10].mxu0  ;;  %v2423_v58 = vpop.f32.mrb[10].mxu1 }
 0x108   :  { %v2360_v59 = vpop.f32.mrb[11].mxu0  ;;  %v2424_v60 = vpop.f32.mrb[11].mxu1 }
 0x109   :  { %v546_v61 = vmax.f32 %v3333_v55, %v3335_v56  ;;  %v3339_v62 = vadd.f32 %v2360_v59, %v2359_v57  ;;  %v3341_v63 = vadd.f32 %v2424_v60, %v2423_v58  ;;  %v2900_v56 = vld [vmem:[%s3671_s3 + $0x2c] ss:$0 sps:$4 sm:$0x33]  }
 0x10b   :  { %v547_v0 = vmax.f32 %v3339_v62, %v3341_v63 }
 0x10d   :  { %v2362_v1 = vpop.f32.mrb[12].mxu0  ;;  %v2426_v2 = vpop.f32.mrb[12].mxu1 }
 0x10e   :  { %v2363_v3 = vpop.f32.mrb[13].mxu0  ;;  %v2427_v4 = vpop.f32.mrb[13].mxu1 }
 0x10f   :  { %v3345_v5 = vadd.f32 %v2363_v3, %v2362_v1  ;;  %v3347_v6 = vadd.f32 %v2427_v4, %v2426_v2  ;;  %v2365_v7 = vpop.f32.mrb[14].mxu0  ;;  %v2429_v9 = vpop.f32.mrb[14].mxu1 }
 0x110   :  { %v2366_v10 = vpop.f32.mrb[15].mxu0  ;;  %v2430_v11 = vpop.f32.mrb[15].mxu1 }
 0x111   :  { %v548_v12 = vmax.f32 %v3345_v5, %v3347_v6  ;;  %v3351_v13 = vadd.f32 %v2366_v10, %v2365_v7  ;;  %v3353_v14 = vadd.f32 %v2430_v11, %v2429_v9 }
 0x113   :  { %v549_v15 = vmax.f32 %v3351_v13, %v3353_v14 }
 0x115   :  { %v2368_v16 = vpop.f32.mrb[16].mxu0  ;;  %v2432_v17 = vpop.f32.mrb[16].mxu1 }
 0x116   :  { %v2369_v18 = vpop.f32.mrb[17].mxu0  ;;  %v2433_v19 = vpop.f32.mrb[17].mxu1 }
 0x117   :  { %v3357_v20 = vadd.f32 %v2369_v18, %v2368_v16  ;;  %v3359_v21 = vadd.f32 %v2433_v19, %v2432_v17  ;;  %v2371_v22 = vpop.f32.mrb[18].mxu0  ;;  %v2435_v23 = vpop.f32.mrb[18].mxu1 }
 0x118   :  { %v2372_v24 = vpop.f32.mrb[19].mxu0  ;;  %v2436_v25 = vpop.f32.mrb[19].mxu1 }
 0x119   :  { %v550_v26 = vmax.f32 %v3357_v20, %v3359_v21  ;;  %v3363_v29 = vadd.f32 %v2372_v24, %v2371_v22  ;;  %v3365_v30 = vadd.f32 %v2436_v25, %v2435_v23 }
 0x11b   :  { %v551_v31 = vmax.f32 %v3363_v29, %v3365_v30 }
 0x11d   :  { %v2374_v32 = vpop.f32.mrb[20].mxu0  ;;  %v2438_v37 = vpop.f32.mrb[20].mxu1 }
 0x11e   :  { %v2375_v38 = vpop.f32.mrb[21].mxu0  ;;  %v2439_v39 = vpop.f32.mrb[21].mxu1 }
 0x11f   :  { %v3369_v40 = vadd.f32 %v2375_v38, %v2374_v32  ;;  %v3371_v43 = vadd.f32 %v2439_v39, %v2438_v37  ;;  %v2377_v44 = vpop.f32.mrb[22].mxu0  ;;  %v2441_v45 = vpop.f32.mrb[22].mxu1 }
 0x120   :  { %v2378_v46 = vpop.f32.mrb[23].mxu0  ;;  %v2442_v51 = vpop.f32.mrb[23].mxu1 }
 0x121   :  { %v552_v52 = vmax.f32 %v3369_v40, %v3371_v43  ;;  %v3375_v53 = vadd.f32 %v2378_v46, %v2377_v44  ;;  %v3377_v54 = vadd.f32 %v2442_v51, %v2441_v45 }
 0x123   :  { %v553_v57 = vmax.f32 %v3375_v53, %v3377_v54 }
 0x125   :  { %v2380_v58 = vpop.f32.mrb[24].mxu0  ;;  %v2444_v59 = vpop.f32.mrb[24].mxu1 }
 0x126   :  { %v2381_v60 = vpop.f32.mrb[25].mxu0  ;;  %v2445_v1 = vpop.f32.mrb[25].mxu1 }
 0x127   :  { %v3381_v2 = vadd.f32 %v2381_v60, %v2380_v58  ;;  %v3383_v3 = vadd.f32 %v2445_v1, %v2444_v59  ;;  %v2383_v4 = vpop.f32.mrb[26].mxu0  ;;  %v2447_v7 = vpop.f32.mrb[26].mxu1 }
 0x128   :  { %v2384_v9 = vpop.f32.mrb[27].mxu0  ;;  %v2448_v10 = vpop.f32.mrb[27].mxu1 }
 0x129   :  { %v554_v11 = vmax.f32 %v3381_v2, %v3383_v3  ;;  %v3387_v16 = vadd.f32 %v2384_v9, %v2383_v4  ;;  %v3389_v17 = vadd.f32 %v2448_v10, %v2447_v7 }
 0x12b   :  { %v3677_v2 = vmax.f32 %v3387_v16, %v3389_v17 }
 0x12d   :  { %v2386_v19 = vpop.f32.mrb[28].mxu0  ;;  %v2450_v22 = vpop.f32.mrb[28].mxu1 }
 0x12e   :  { %v2387_v23 = vpop.f32.mrb[29].mxu0  ;;  %v2451_v24 = vpop.f32.mrb[29].mxu1 }
 0x12f   :  { %v3393_v25 = vadd.f32 %v2387_v23, %v2386_v19  ;;  %v3395_v32 = vadd.f32 %v2451_v24, %v2450_v22  ;;  %v2389_v37 = vpop.f32.mrb[30].mxu0  ;;  %v2453_v38 = vpop.f32.mrb[30].mxu1 }
 0x130   :  { %v2390_v39 = vpop.f32.mrb[31].mxu0  ;;  %v2454_v44 = vpop.f32.mrb[31].mxu1 }
 0x131   :  { %v3399_v46 = vadd.f32 %v2390_v39, %v2389_v37  ;;  %v3401_v51 = vadd.f32 %v2454_v44, %v2453_v38 }
 0x135   :  { %v2472_v59 = vpop.f32.mrb[32].mxu0  ;;  %v2536_v60 = vpop.f32.mrb[32].mxu1 }
 0x136   :  { %v2473_v1 = vpop.f32.mrb[33].mxu0  ;;  %v2537_v4 = vpop.f32.mrb[33].mxu1 }
 0x137   :  { %v2474_v7 = vadd.f32 %v2473_v1, %v2472_v59  ;;  %v2538_v9 = vadd.f32 %v2537_v4, %v2536_v60  ;;  %v2475_v10 = vpop.f32.mrb[34].mxu0  ;;  %v2539_v19 = vpop.f32.mrb[34].mxu1  ;;  %v3414_v59 = vld [vmem:[%s3672_s2] ss:$0 sm:$0xff] }
 0x138   :  { %v2476_v22 = vpop.f32.mrb[35].mxu0  ;;  %v2540_v23 = vpop.f32.mrb[35].mxu1 }
 0x139   :  { %v752_v24 = vmax.f32 %v542_v33, %v2474_v7  ;;  %v2477_v37 = vadd.f32 %v2476_v22, %v2475_v10  ;;  %v2541_v38 = vadd.f32 %v2540_v23, %v2539_v19  ;;  %v2895_v22 = vld [vmem:[%s3671_s3] sm:$0xff]  }
 0x13b   :  { %v962_v39 = vmax.f32 %v752_v24, %v2538_v9  ;;  %v753_v44 = vmax.f32 %v543_v36, %v2477_v37 }
 0x13d   :  { %v963_v58 = vmax.f32 %v753_v44, %v2541_v38  ;;  %v2478_v45 = vpop.f32.mrb[36].mxu0  ;;  %v2542_v18 = vpop.f32.mrb[36].mxu1 }
 0x13e   :  { %v2479_v60 = vpop.f32.mrb[37].mxu0  ;;  %v2543_v1 = vpop.f32.mrb[37].mxu1 }
 0x13f   :  { %v986_v27 = vadd.f32 %v3414_v59, %v963_v58  ;;  %v2480_v28 = vadd.f32 %v2479_v60, %v2478_v45  ;;  %v2481_v33 = vpop.f32.mrb[38].mxu0  ;;  %v2544_v4 = vadd.f32 %v2543_v1, %v2542_v18  ;;  %v2545_v7 = vpop.f32.mrb[38].mxu1  ;;  %v2896_v45 = vld [vmem:[%s3671_s3 + $0x8] ss:$0 sps:$4 sm:$0x33]   ;;  %v985_v18 = vadd.f32 %v3414_v59, %v962_v39 }
 0x140   :  { %v2482_v9 = vpop.f32.mrb[39].mxu0  ;;  %v2546_v10 = vpop.f32.mrb[39].mxu1  ;;  %v1096_v60 = vsel %vm1039_vm0, %v2896_v45, 0 }
 0x141   :  { %v1002_v34 = vmax.f32 %v986_v27, 0.0  ;;  %v754_v35 = vmax.f32 %v544_v47, %v2480_v28  ;;  %v2483_v36 = vadd.f32 %v2482_v9, %v2481_v33  ;;  %v2547_v19 = vadd.f32 %v2546_v10, %v2545_v7 }
 0x142   :  { %v1001_v39 = vmax.f32 %v985_v18, 0.0 }
 0x143   :  { %v1021_v58 = vpack.c.bf16 %v1002_v34, %v1002_v34  ;;  %v755_v23 = vmax.f32 %v545_v50, %v2483_v36  ;;  %v964_v41 = vmax.f32 %v754_v35, %v2544_v4  ;;  %v2897_v4 = vld [vmem:[%s3671_s3 + $0x30] sm:$0xff]   ;;  %v2899_v34 = vld [vmem:[%s3671_s3 + $0x38] ss:$0 sps:$4 sm:$0x33]  }
 0x144   :  { %v1278_v63 = vsel %vm1039_vm0, %v2899_v34, 0 }
 0x145   :  { %v987_v42 = vadd.f32 %v3414_v59, %v964_v41  ;;  %v965_v47 = vmax.f32 %v755_v23, %v2547_v19  ;;  %v2484_v24 = vpop.f32.mrb[40].mxu0  ;;  %2642 = vmatmul.mubr.msk.bf16.vlgmr.msra.gmra.mrb[64].mxu1 %vm1035_vm2, %v1021_v58  ;;  %v2548_v37 = vpop.f32.mrb[40].mxu1  ;;  %v2898_v19 = vld [vmem:[%s3671_s3 + $0x24] sm:$0xff]  }
 0x146   :  { %v2485_v38 = vpop.f32.mrb[41].mxu0  ;;  %2646 = vmatpush3.bf16.msra.mxu1 %v2895_v22  ;;  %v2549_v44 = vpop.f32.mrb[41].mxu1  ;;  %2649 = vmatprep.mubr.msk.bf16.mxu1 %vm2932_vm1, %v2931_v8  ;;  %v1017_v22 = vpack.c.bf16 %v1001_v39, %v1001_v39 }
 0x147   :  { %v1003_v1 = vmax.f32 %v987_v42, 0.0  ;;  %v2486_v48 = vadd.f32 %v2485_v38, %v2484_v24  ;;  %v2487_v49 = vpop.f32.mrb[42].mxu0  ;;  %v2550_v50 = vadd.f32 %v2549_v44, %v2548_v37  ;;  %v2551_v27 = vpop.f32.mrb[42].mxu1  ;;  %2647 = vmatprep.subr.bf16.mxu1 %v2931_v8  ;;  %v988_v35 = vadd.f32 %v3414_v59, %v965_v47 }
 0x148   :  { %v2488_v28 = vpop.f32.mrb[43].mxu0  ;;  %v2552_v33 = vpop.f32.mrb[43].mxu1  ;;  %v1217_v44 = vsel %vm1039_vm0, %v2900_v56, 0 }
 0x149   :  { %v1138_v7 = vpack.c.bf16 %v1003_v1, %v1003_v1  ;;  %v756_v9 = vmax.f32 %v546_v61, %v2486_v48  ;;  %v2489_v10 = vadd.f32 %v2488_v28, %v2487_v49  ;;  %v2553_v36 = vadd.f32 %v2552_v33, %v2551_v27  ;;  %v2901_v1 = vld [vmem:[%s3671_s3 + $0x48] sm:$0xff]   ;;  %v2903_v27 = vld [vmem:[%s3671_s3 + $0x50] ss:$0 sps:$4 sm:$0x33]  }
 0x14a   :  { %2648 = vmatpush3.bf16.msra.mxu1 %v1096_v60  ;;  %v1400_v13 = vsel %vm1039_vm0, %v2903_v27, 0 }
 0x14b   :  { %v757_v45 = vmax.f32 %v547_v0, %v2489_v10  ;;  %v966_v55 = vmax.f32 %v756_v9, %v2550_v50  ;;  %2658 = vmatmul.mubr.msk.bf16.vlgmr.msra.gmra.mrb[64].mxu0 %vm1035_vm2, %v1138_v7  ;;  %2661 = vmatprep.subr.bf16.mxu1 %v2931_v8  ;;  %v1004_v0 = vmax.f32 %v988_v35, 0.0  ;;  %v2904_v7 = vld [vmem:[%s3671_s3 + $0x44] ss:$0 sps:$4 sm:$0x33]  }
 0x14c   :  { %2670 = vmatpush3.bf16.msra.mxu0 %v2897_v4  ;;  %2673 = vmatprep.mubr.msk.bf16.mxu0 %vm2932_vm1, %v2931_v8  ;;  %v2902_v4 = vld [vmem:[%s3671_s3 + $0x3c] sm:$0xff]  }
 0x14d   :  { %v989_v61 = vadd.f32 %v3414_v59, %v966_v55  ;;  %v967_v18 = vmax.f32 %v757_v45, %v2553_v36  ;;  %v2490_v58 = vpop.f32.mrb[44].mxu0  ;;  %2650 = vmatmul.mubr.msk.bf16.vlgmr.msra.gmra.mrb[68].mxu1 %vm1035_vm2, %v1017_v22  ;;  %v2554_v62 = vpop.f32.mrb[44].mxu1  ;;  %2671 = vmatprep.subr.bf16.mxu0 %v2931_v8  ;;  %v1199_v28 = vpack.c.bf16 %v1004_v0, %v1004_v0  ;;  %v1339_v36 = vsel %vm1039_vm0, %v2904_v7, 0 }
 0x14e   :  { %v2491_v23 = vpop.f32.mrb[45].mxu0  ;;  %2662 = vmatpush3.bf16.msra.mxu1 %v2898_v19  ;;  %v2555_v41 = vpop.f32.mrb[45].mxu1  ;;  %2665 = vmatprep.mubr.msk.bf16.mxu1 %vm2932_vm1, %v2931_v8 }
 0x14f   :  { %v1005_v42 = vmax.f32 %v989_v61, 0.0  ;;  %v2492_v47 = vadd.f32 %v2491_v23, %v2490_v58  ;;  %v2493_v24 = vpop.f32.mrb[46].mxu0  ;;  %v2556_v37 = vadd.f32 %v2555_v41, %v2554_v62  ;;  %v2557_v38 = vpop.f32.mrb[46].mxu1  ;;  %2663 = vmatprep.subr.bf16.mxu1 %v2931_v8  ;;  %v990_v5 = vadd.f32 %v3414_v59, %v967_v18  ;;  %v2905_v62 = vld [vmem:[%s3671_s3 + $0x60] sm:$0xff]  }
 0x150   :  { %v2494_v60 = vpop.f32.mrb[47].mxu0  ;;  %2672 = vmatpush3.bf16.msra.mxu0 %v1278_v63  ;;  %v2558_v39 = vpop.f32.mrb[47].mxu1  ;;  %v2907_v41 = vld [vmem:[%s3671_s3 + $0x68] ss:$0 sps:$4 sm:$0x33]  }
 0x151   :  { %v1260_v48 = vpack.c.bf16 %v1005_v42, %v1005_v42  ;;  %v758_v49 = vmax.f32 %v548_v12, %v2492_v47  ;;  %v2495_v50 = vadd.f32 %v2494_v60, %v2493_v24  ;;  %2685 = vmatprep.subr.bf16.mxu0 %v2931_v8  ;;  %v2559_v33 = vadd.f32 %v2558_v39, %v2557_v38  ;;  %v2906_v24 = vld [vmem:[%s3671_s3 + $0x54] sm:$0xff]  }
 0x152   :  { %2664 = vmatpush3.bf16.msra.mxu1 %v1217_v44  ;;  %v1006_v19 = vmax.f32 %v990_v5, 0.0  ;;  %v1522_v30 = vsel %vm1039_vm0, %v2907_v41, 0  ;;  %v2909_v5 = vld [vmem:[%s3671_s3 + $0x78] sm:$0xff]  }
 0x153   :  { %v759_v6 = vmax.f32 %v549_v15, %v2495_v50  ;;  %v968_v12 = vmax.f32 %v758_v49, %v2556_v37  ;;  %2674 = vmatmul.mubr.msk.bf16.vlgmr.msra.gmra.mrb[68].mxu0 %vm1035_vm2, %v1260_v48  ;;  %2677 = vmatprep.subr.bf16.mxu1 %v2931_v8 }
 0x154   :  { %2686 = vmatpush3.bf16.msra.mxu0 %v2901_v1  ;;  %2689 = vmatprep.mubr.msk.bf16.mxu0 %vm2932_vm1, %v2931_v8  ;;  %v1321_v37 = vpack.c.bf16 %v1006_v19, %v1006_v19 }
 0x155   :  { %v991_v9 = vadd.f32 %v3414_v59, %v968_v12  ;;  %v969_v10 = vmax.f32 %v759_v6, %v2559_v33  ;;  %v2496_v34 = vpop.f32.mrb[48].mxu0  ;;  %2666 = vmatmul.mubr.msk.bf16.vlgmr.msra.gmra.mrb[72].mxu1 %vm1035_vm2, %v1199_v28  ;;  %v2560_v35 = vpop.f32.mrb[48].mxu1  ;;  %2687 = vmatprep.subr.bf16.mxu0 %v2931_v8 }
 0x156   :  { %v2497_v14 = vpop.f32.mrb[49].mxu0  ;;  %2678 = vmatpush3.bf16.msra.mxu1 %v2902_v4  ;;  %v2561_v15 = vpop.f32.mrb[49].mxu1  ;;  %2681 = vmatprep.mubr.msk.bf16.mxu1 %vm2932_vm1, %v2931_v8 }
 0x157   :  { %v1007_v22 = vmax.f32 %v991_v9, 0.0  ;;  %v2498_v45 = vadd.f32 %v2497_v14, %v2496_v34  ;;  %v2499_v55 = vpop.f32.mrb[50].mxu0  ;;  %v2562_v56 = vadd.f32 %v2561_v15, %v2560_v35  ;;  %v2563_v61 = vpop.f32.mrb[50].mxu1  ;;  %2679 = vmatprep.subr.bf16.mxu1 %v2931_v8  ;;  %v992_v42 = vadd.f32 %v3414_v59, %v969_v10  ;;  %v2911_v10 = vld [vmem:[%s3671_s3 + $0x80] ss:$0 sps:$4 sm:$0x33]  }
 0x158   :  { %v2500_v18 = vpop.f32.mrb[51].mxu0  ;;  %2688 = vmatpush3.bf16.msra.mxu0 %v1400_v13  ;;  %v2564_v58 = vpop.f32.mrb[51].mxu1  ;;  %v2910_v13 = vld [vmem:[%s3671_s3 + $0x6c] sm:$0xff]   ;;  %v2912_v14 = vld [vmem:[%s3671_s3 + $0x74] ss:$0 sps:$4 sm:$0x33]  }
 0x159   :  { %v1382_v63 = vpack.c.bf16 %v1007_v22, %v1007_v22  ;;  %v760_v0 = vmax.f32 %v550_v26, %v2498_v45  ;;  %v2501_v23 = vadd.f32 %v2500_v18, %v2499_v55  ;;  %2701 = vmatprep.subr.bf16.mxu0 %v2931_v8  ;;  %v2565_v47 = vadd.f32 %v2564_v58, %v2563_v61  ;;  %v2908_v26 = vld [vmem:[%s3671_s3 + $0x5c] ss:$0 sps:$4 sm:$0x33]  }
 0x15a   :  { %2680 = vmatpush3.bf16.msra.mxu1 %v1339_v36  ;;  %v1461_v33 = vsel %vm1039_vm0, %v2908_v26, 0  ;;  %v1644_v53 = vsel %vm1039_vm0, %v2911_v10, 0  ;;  %v1583_v45 = vsel %vm1039_vm0, %v2912_v14, 0  ;;  %v2919_v10 = vld [vmem:[%s3671_s3 + $0xb0] ss:$0 sps:$4 sm:$0x33]  }
 0x15b   :  { %v761_v20 = vmax.f32 %v551_v31, %v2501_v23  ;;  %v970_v21 = vmax.f32 %v760_v0, %v2562_v56  ;;  %2690 = vmatmul.mubr.msk.bf16.vlgmr.msra.gmra.mrb[72].mxu0 %vm1035_vm2, %v1382_v63  ;;  %2693 = vmatprep.subr.bf16.mxu1 %v2931_v8  ;;  %v1008_v31 = vmax.f32 %v992_v42, 0.0  ;;  %v2913_v23 = vld [vmem:[%s3671_s3 + $0x90] sm:$0xff]  }
 0x15c   :  { %2702 = vmatpush3.bf16.msra.mxu0 %v2905_v62  ;;  %2705 = vmatprep.mubr.msk.bf16.mxu0 %vm2932_vm1, %v2931_v8 }
 0x15d   :  { %v993_v38 = vadd.f32 %v3414_v59, %v970_v21  ;;  %v971_v44 = vmax.f32 %v761_v20, %v2565_v47  ;;  %v2502_v60 = vpop.f32.mrb[52].mxu0  ;;  %2682 = vmatmul.mubr.msk.bf16.vlgmr.msra.gmra.mrb[76].mxu1 %vm1035_vm2, %v1321_v37  ;;  %v2566_v29 = vpop.f32.mrb[52].mxu1  ;;  %2703 = vmatprep.subr.bf16.mxu0 %v2931_v8  ;;  %v1443_v34 = vpack.c.bf16 %v1008_v31, %v1008_v31  ;;  %v2914_v21 = vld [vmem:[%s3671_s3 + $0x84] sm:$0xff]  }
 0x15e   :  { %v2503_v39 = vpop.f32.mrb[53].mxu0  ;;  %2694 = vmatpush3.bf16.msra.mxu1 %v2906_v24  ;;  %v2567_v1 = vpop.f32.mrb[53].mxu1  ;;  %2697 = vmatprep.mubr.msk.bf16.mxu1 %vm2932_vm1, %v2931_v8  ;;  %v2915_v24 = vld [vmem:[%s3671_s3 + $0x98] ss:$0 sps:$4 sm:$0x33]  }
 0x15f   :  { %v1009_v48 = vmax.f32 %v993_v38, 0.0  ;;  %v2504_v49 = vadd.f32 %v2503_v39, %v2502_v60  ;;  %v2505_v50 = vpop.f32.mrb[54].mxu0  ;;  %v2568_v27 = vadd.f32 %v2567_v1, %v2566_v29  ;;  %v2569_v28 = vpop.f32.mrb[54].mxu1  ;;  %2695 = vmatprep.subr.bf16.mxu1 %v2931_v8  ;;  %v994_v40 = vadd.f32 %v3414_v59, %v971_v44  ;;  %v2916_v38 = vld [vmem:[%s3671_s3 + $0x8c] ss:$0 sps:$4 sm:$0x33]  }
 0x160   :  { %v2506_v4 = vpop.f32.mrb[55].mxu0  ;;  %2704 = vmatpush3.bf16.msra.mxu0 %v1522_v30  ;;  %v2570_v7 = vpop.f32.mrb[55].mxu1  ;;  %v1766_v17 = vsel %vm1039_vm0, %v2915_v24, 0 }
 0x161   :  { %v1504_v6 = vpack.c.bf16 %v1009_v48, %v1009_v48  ;;  %v762_v12 = vmax.f32 %v552_v52, %v2504_v49  ;;  %v2507_v9 = vadd.f32 %v2506_v4, %v2505_v50  ;;  %2717 = vmatprep.subr.bf16.mxu0 %v2931_v8  ;;  %v2571_v35 = vadd.f32 %v2570_v7, %v2569_v28  ;;  %v2917_v7 = vld [vmem:[%s3671_s3 + $0xa8] sm:$0xff]  }
 0x162   :  { %2696 = vmatpush3.bf16.msra.mxu1 %v1461_v33  ;;  %v1010_v55 = vmax.f32 %v994_v40, 0.0  ;;  %v1705_v28 = vsel %vm1039_vm0, %v2916_v38, 0 }
 0x163   :  { %v763_v43 = vmax.f32 %v553_v57, %v2507_v9  ;;  %v972_v52 = vmax.f32 %v762_v12, %v2568_v27  ;;  %2706 = vmatmul.mubr.msk.bf16.vlgmr.msra.gmra.mrb[76].mxu0 %vm1035_vm2, %v1504_v6  ;;  %2709 = vmatprep.subr.bf16.mxu1 %v2931_v8  ;;  %v3678_v6 = vmax.f32 %v3393_v25, %v3395_v32 }
 0x164   :  { %2718 = vmatpush3.bf16.msra.mxu0 %v2909_v5  ;;  %2721 = vmatprep.mubr.msk.bf16.mxu0 %vm2932_vm1, %v2931_v8  ;;  %v1565_v26 = vpack.c.bf16 %v1010_v55, %v1010_v55  ;;  %v3679_v25 = vmax.f32 %v3399_v46, %v3401_v51  ;;  %v1888_v46 = vsel %vm1039_vm0, %v2919_v10, 0 }
 0x165   :  { %v995_v15 = vadd.f32 %v3414_v59, %v972_v52  ;;  %v973_v36 = vmax.f32 %v763_v43, %v2571_v35  ;;  %v2508_v19 = vpop.f32.mrb[56].mxu0  ;;  %2698 = vmatmul.mubr.msk.bf16.vlgmr.msra.gmra.mrb[80].mxu1 %vm1035_vm2, %v1443_v34  ;;  %v2572_v22 = vpop.f32.mrb[56].mxu1  ;;  %2719 = vmatprep.subr.bf16.mxu0 %v2931_v8  ;;  %v2920_v43 = vld [vmem:[%s3671_s3 + $0xa4] ss:$0 sps:$4 sm:$0x33]  }
 0x166   :  { %v2509_v54 = vpop.f32.mrb[57].mxu0  ;;  %2710 = vmatpush3.bf16.msra.mxu1 %v2910_v13  ;;  %v2573_v57 = vpop.f32.mrb[57].mxu1  ;;  %2713 = vmatprep.mubr.msk.bf16.mxu1 %vm2932_vm1, %v2931_v8  ;;  %v2918_v13 = vld [vmem:[%s3671_s3 + $0x9c] sm:$0xff]  }
 0x167   :  { %v1011_v56 = vmax.f32 %v995_v15, 0.0  ;;  %v2510_v61 = vadd.f32 %v2509_v54, %v2508_v19  ;;  %v2511_v18 = vpop.f32.mrb[58].mxu0  ;;  %v2574_v58 = vadd.f32 %v2573_v57, %v2572_v22  ;;  %v2575_v62 = vpop.f32.mrb[58].mxu1  ;;  %2711 = vmatprep.subr.bf16.mxu1 %v2931_v8  ;;  %v996_v37 = vadd.f32 %v3414_v59, %v973_v36  ;;  %v2921_v54 = vld [vmem:[%s3671_s3 + $0xb4] sm:$0xff]  }
 0x168   :  { %v2512_v63 = vpop.f32.mrb[59].mxu0  ;;  %2720 = vmatpush3.bf16.msra.mxu0 %v1644_v53  ;;  %v2576_v0 = vpop.f32.mrb[59].mxu1  ;;  %v1827_v22 = vsel %vm1039_vm0, %v2920_v43, 0 }
 0x169   :  { %v1626_v41 = vpack.c.bf16 %v1011_v56, %v1011_v56  ;;  %v764_v42 = vmax.f32 %v554_v11, %v2510_v61  ;;  %v2513_v47 = vadd.f32 %v2512_v63, %v2511_v18  ;;  %2733 = vmatprep.subr.bf16.mxu0 %v2931_v8  ;;  %v2577_v20 = vadd.f32 %v2576_v0, %v2575_v62  ;;  %v2923_v61 = vld [vmem:[%s3673_s5] sm:$0xff]   ;;  %v2924_v18 = vld [vmem:[%s3673_s5 + $0x8] sm:$0xff]   ;;  %v2926_v62 = vld [vmem:[%s3673_s5 + $0x18] ss:$0 sps:$4 sm:$0x11]  }
 0x16a   :  { %2712 = vmatpush3.bf16.msra.mxu1 %v1583_v45  ;;  %v1012_v30 = vmax.f32 %v996_v37, 0.0  ;;  %v2043_v63 = vsel %vm2041_vm3, %v2926_v62, 0 }
 0x16b   :  { %v765_v3 = vmax.f32 %v3677_v2, %v2513_v47  ;;  %v974_v11 = vmax.f32 %v764_v42, %v2574_v58  ;;  %2722 = vmatmul.mubr.msk.bf16.vlgmr.msra.gmra.mrb[80].mxu0 %vm1035_vm2, %v1626_v41  ;;  %2725 = vmatprep.subr.bf16.mxu1 %v2931_v8  ;;  %v2925_v58 = vld [vmem:[%s3673_s5 + $0x10] sm:$0xff]  }
 0x16c   :  { %2734 = vmatpush3.bf16.msra.mxu0 %v2913_v23  ;;  %2737 = vmatprep.mubr.msk.bf16.mxu0 %vm2932_vm1, %v2931_v8  ;;  %v1687_v34 = vpack.c.bf16 %v1012_v30, %v1012_v30 }
 0x16d   :  { %v997_v44 = vadd.f32 %v3414_v59, %v974_v11  ;;  %v975_v60 = vmax.f32 %v765_v3, %v2577_v20  ;;  %v2514_v29 = vpop.f32.mrb[60].mxu0  ;;  %2714 = vmatmul.mubr.msk.bf16.vlgmr.msra.gmra.mrb[84].mxu1 %vm1035_vm2, %v1565_v26  ;;  %v2578_v16 = vpop.f32.mrb[60].mxu1  ;;  %2735 = vmatprep.subr.bf16.mxu0 %v2931_v8 }
 0x16e   :  { %v2515_v31 = vpop.f32.mrb[61].mxu0  ;;  %2726 = vmatpush3.bf16.msra.mxu1 %v2914_v21  ;;  %v2579_v39 = vpop.f32.mrb[61].mxu1  ;;  %2729 = vmatprep.mubr.msk.bf16.mxu1 %vm2932_vm1, %v2931_v8 }
 0x16f   :  { %v1013_v1 = vmax.f32 %v997_v44, 0.0  ;;  %v2516_v48 = vadd.f32 %v2515_v31, %v2514_v29  ;;  %v2517_v49 = vpop.f32.mrb[62].mxu0  ;;  %v2580_v50 = vadd.f32 %v2579_v39, %v2578_v16  ;;  %v2581_v27 = vpop.f32.mrb[62].mxu1  ;;  %2727 = vmatprep.subr.bf16.mxu1 %v2931_v8  ;;  %v998_v14 = vadd.f32 %v3414_v59, %v975_v60 }
 0x170   :  { %v2518_v33 = vpop.f32.mrb[63].mxu0  ;;  %2736 = vmatpush3.bf16.msra.mxu0 %v1766_v17  ;;  %v2582_v4 = vpop.f32.mrb[63].mxu1 }
 0x171   :  { %v1748_v5 = vpack.c.bf16 %v1013_v1, %v1013_v1  ;;  %v766_v12 = vmax.f32 %v3678_v6, %v2516_v48  ;;  %v2519_v9 = vadd.f32 %v2518_v33, %v2517_v49  ;;  %2749 = vmatprep.subr.bf16.mxu0 %v2931_v8  ;;  %v2583_v35 = vadd.f32 %v2582_v4, %v2581_v27 }
 0x172   :  { %2728 = vmatpush3.bf16.msra.mxu1 %v1705_v28  ;;  %v1014_v51 = vmax.f32 %v998_v14, 0.0 }
 0x173   :  { %v767_v32 = vmax.f32 %v3679_v25, %v2519_v9  ;;  %v976_v40 = vmax.f32 %v766_v12, %v2580_v50  ;;  %2738 = vmatmul.mubr.msk.bf16.vlgmr.msra.gmra.mrb[84].mxu0 %vm1035_vm2, %v1748_v5  ;;  %2741 = vmatprep.subr.bf16.mxu1 %v2931_v8 }
 0x174   :  { %2750 = vmatpush3.bf16.msra.mxu0 %v2917_v7  ;;  %2753 = vmatprep.mubr.msk.bf16.mxu0 %vm2932_vm1, %v2931_v8  ;;  %v1809_v57 = vpack.c.bf16 %v1014_v51, %v1014_v51 }
 0x175   :  { %v999_v52 = vadd.f32 %v3414_v59, %v976_v40  ;;  %v977_v15 = vmax.f32 %v767_v32, %v2583_v35  ;;  %2730 = vmatmul.mubr.msk.bf16.vlgmr.msra.gmra.mrb[88].mxu1 %vm1035_vm2, %v1687_v34  ;;  %2751 = vmatprep.subr.bf16.mxu0 %v2931_v8 }
 0x176   :  { %2742 = vmatpush3.bf16.msra.mxu1 %v2918_v13  ;;  %2745 = vmatprep.mubr.msk.bf16.mxu1 %vm2932_vm1, %v2931_v8 }
 0x177   :  { %v1015_v36 = vmax.f32 %v999_v52, 0.0  ;;  %v1000_v19 = vadd.f32 %v3414_v59, %v977_v15  ;;  %2743 = vmatprep.subr.bf16.mxu1 %v2931_v8  ;;  %v2922_v59 = vld [vmem:[%s3671_s3 + $0xbc] ss:$0 sps:$4 sm:$0x33]  }
 0x178   :  { %2752 = vmatpush3.bf16.msra.mxu0 %v1888_v46  ;;  %v1949_v55 = vsel %vm1039_vm0, %v2922_v59, 0 }
 0x179   :  { %v1870_v53 = vpack.c.bf16 %v1015_v36, %v1015_v36  ;;  %2765 = vmatprep.subr.bf16.mxu0 %v2931_v8  ;;  %v1016_v45 = vmax.f32 %v1000_v19, 0.0 }
 0x17a   :  { %2744 = vmatpush3.bf16.msra.mxu1 %v1827_v22 }
 0x17b   :  { %2754 = vmatmul.mubr.msk.bf16.vlgmr.msra.gmra.mrb[88].mxu0 %vm1035_vm2, %v1870_v53  ;;  %2757 = vmatprep.subr.bf16.mxu1 %v2931_v8  ;;  %v1931_v56 = vpack.c.bf16 %v1016_v45, %v1016_v45 }
 0x17c   :  { %2773 = vmatprep.mubr.msk.bf16.mxu0 %vm2932_vm1, %v2931_v8  ;;  %2766 = vmatpush3.bf16.msra.mxu0 %v2923_v61 }
 0x17d   :  { %2746 = vmatmul.mubr.msk.bf16.vlgmr.msra.gmra.mrb[92].mxu1 %vm1035_vm2, %v1809_v57  ;;  %2767 = vmatprep.subr.bf16.mxu0 %v2931_v8 }
 0x17e   :  { %2758 = vmatpush3.bf16.msra.mxu1 %v2921_v54  ;;  %2761 = vmatprep.mubr.msk.bf16.mxu1 %vm2932_vm1, %v2931_v8 }
 0x17f   :  { %2759 = vmatprep.subr.bf16.mxu1 %v2931_v8 }
 0x180   :  { %2768 = vmatpush3.bf16.msra.mxu0 %v2924_v18 }
 0x181   :  { %2769 = vmatprep.subr.bf16.mxu0 %v2931_v8 }
 0x182   :  { %2760 = vmatpush3.bf16.msra.mxu1 %v1949_v55 }
 0x184   :  { %2770 = vmatpush3.bf16.msra.mxu0 %v2925_v58 }
 0x185   :  { %2762 = vmatmul.mubr.msk.bf16.vlgmr.msra.gmra.mrb[96].mxu1 %vm1035_vm2, %v1931_v56  ;;  %2771 = vmatprep.subr.bf16.mxu0 %v2931_v8 }
 0x188   :  { %2772 = vmatpush3.bf16.msra.mxu0 %v2043_v63 }
 0x218   :  { %v1077_v0 = vpop.f32.mrb[64].mxu1 }
 0x219   :  { %v2643_v23 = vpop.f32.mrb[65].mxu1 }
 0x21a   :  { %v1080_v41 = vpop.f32.mrb[66].mxu1 }
 0x21b   :  { %v2644_v42 = vpop.f32.mrb[67].mxu1 }
 0x21e   :  { %v1192_v47 = vpop.f32.mrb[64].mxu0 }
 0x21f   :  { %v2659_v24 = vpop.f32.mrb[65].mxu0 }
 0x220   :  { %v1132_v37 = vpop.f32.mrb[68].mxu1  ;;  %v1195_v20 = vpop.f32.mrb[66].mxu0 }
 0x221   :  { %v1133_v21 = vadd.f32 %v1132_v37, %v1077_v0  ;;  %v2651_v26 = vpop.f32.mrb[69].mxu1  ;;  %v2660_v2 = vpop.f32.mrb[67].mxu0 }
 0x222   :  { %v1135_v3 = vpop.f32.mrb[70].mxu1 }
 0x223   :  { %v2652_v8 = vpop.f32.mrb[71].mxu1  ;;  %v1198_v11 = vadd.f32 %v1192_v47, %v1133_v21  ;;  %v2321_v3 = vld [vmem:[%s3674_s4] ss:$0 sm:$0xff] }
 0x226   :  { %v1314_v38 = vpop.f32.mrb[68].mxu0 }
 0x227   :  { %v2675_v44 = vpop.f32.mrb[69].mxu0 }
 0x228   :  { %v1253_v60 = vpop.f32.mrb[72].mxu1  ;;  %v1317_v29 = vpop.f32.mrb[70].mxu0 }
 0x229   :  { %v1259_v16 = vadd.f32 %v1253_v60, %v1198_v11  ;;  %v2667_v17 = vpop.f32.mrb[73].mxu1  ;;  %v2676_v30 = vpop.f32.mrb[71].mxu0 }
 0x22a   :  { %v1256_v31 = vpop.f32.mrb[74].mxu1  ;;  %v2322_v17 = vld [vmem:[%s3675_s6] ss:$0 sm:$0xff] }
 0x22b   :  { %v2668_v39 = vpop.f32.mrb[75].mxu1  ;;  %v1320_v1 = vadd.f32 %v1314_v38, %v1259_v16 }
 0x22e   :  { %v1436_v48 = vpop.f32.mrb[72].mxu0 }
 0x22f   :  { %v2691_v49 = vpop.f32.mrb[73].mxu0 }
 0x230   :  { %v1375_v50 = vpop.f32.mrb[76].mxu1  ;;  %v1439_v27 = vpop.f32.mrb[74].mxu0 }
 0x231   :  { %v1381_v28 = vadd.f32 %v1375_v50, %v1320_v1  ;;  %v2683_v33 = vpop.f32.mrb[77].mxu1  ;;  %v2692_v4 = vpop.f32.mrb[75].mxu0 }
 0x232   :  { %v1378_v7 = vpop.f32.mrb[78].mxu1 }
 0x233   :  { %v2684_v5 = vpop.f32.mrb[79].mxu1  ;;  %v1442_v6 = vadd.f32 %v1436_v48, %v1381_v28 }
 0x236   :  { %v1558_v12 = vpop.f32.mrb[76].mxu0 }
 0x237   :  { %v2707_v9 = vpop.f32.mrb[77].mxu0 }
 0x238   :  { %v1497_v10 = vpop.f32.mrb[80].mxu1  ;;  %v1561_v34 = vpop.f32.mrb[78].mxu0 }
 0x239   :  { %v1503_v35 = vadd.f32 %v1497_v10, %v1442_v6  ;;  %v2699_v13 = vpop.f32.mrb[81].mxu1  ;;  %v2708_v14 = vpop.f32.mrb[79].mxu0 }
 0x23a   :  { %v1500_v25 = vpop.f32.mrb[82].mxu1 }
 0x23b   :  { %v2700_v32 = vpop.f32.mrb[83].mxu1  ;;  %v1564_v40 = vadd.f32 %v1558_v12, %v1503_v35 }
 0x23e   :  { %v1680_v43 = vpop.f32.mrb[80].mxu0 }
 0x23f   :  { %v2723_v52 = vpop.f32.mrb[81].mxu0 }
 0x240   :  { %v1619_v15 = vpop.f32.mrb[84].mxu1  ;;  %v1683_v46 = vpop.f32.mrb[82].mxu0 }
 0x241   :  { %v1625_v51 = vadd.f32 %v1619_v15, %v1564_v40  ;;  %v2715_v36 = vpop.f32.mrb[85].mxu1  ;;  %v2724_v19 = vpop.f32.mrb[83].mxu0 }
 0x242   :  { %v1622_v22 = vpop.f32.mrb[86].mxu1 }
 0x243   :  { %v2716_v53 = vpop.f32.mrb[87].mxu1  ;;  %v1686_v54 = vadd.f32 %v1680_v43, %v1625_v51 }
 0x246   :  { %v1802_v57 = vpop.f32.mrb[84].mxu0 }
 0x247   :  { %v2739_v59 = vpop.f32.mrb[85].mxu0 }
 0x248   :  { %v1741_v45 = vpop.f32.mrb[88].mxu1  ;;  %v1805_v55 = vpop.f32.mrb[86].mxu0 }
 0x249   :  { %v1747_v56 = vadd.f32 %v1741_v45, %v1686_v54  ;;  %v2731_v61 = vpop.f32.mrb[89].mxu1  ;;  %v2740_v18 = vpop.f32.mrb[87].mxu0 }
 0x24a   :  { %v1744_v58 = vpop.f32.mrb[90].mxu1 }
 0x24b   :  { %v2732_v62 = vpop.f32.mrb[91].mxu1  ;;  %v1808_v63 = vadd.f32 %v1802_v57, %v1747_v56 }
 0x24e   :  { %v1924_v0 = vpop.f32.mrb[88].mxu0 }
 0x24f   :  { %v2755_v23 = vpop.f32.mrb[89].mxu0 }
 0x250   :  { %v1863_v41 = vpop.f32.mrb[92].mxu1  ;;  %v1927_v42 = vpop.f32.mrb[90].mxu0 }
 0x251   :  { %v1869_v47 = vadd.f32 %v1863_v41, %v1808_v63  ;;  %v2747_v24 = vpop.f32.mrb[93].mxu1  ;;  %v2756_v37 = vpop.f32.mrb[91].mxu0 }
 0x252   :  { %v1866_v20 = vpop.f32.mrb[94].mxu1 }
 0x253   :  { %v2748_v21 = vpop.f32.mrb[95].mxu1  ;;  %v1930_v26 = vadd.f32 %v1924_v0, %v1869_v47 }
 0x258   :  { %v1985_v2 = vpop.f32.mrb[96].mxu1 }
 0x259   :  { %v1991_v8 = vadd.f32 %v1985_v2, %v1930_v26  ;;  %v2763_v11 = vpop.f32.mrb[97].mxu1 }
 0x25a   :  { %v1988_v38 = vpop.f32.mrb[98].mxu1 }
 0x25b   :  { %v1999_v44 = vadd.f32 %v2321_v3, %v1991_v8  ;;  %v2764_v60 = vpop.f32.mrb[99].mxu1 }
 0x25d   :  { %v2000_v29 = vmax.f32 %v1999_v44, 0.0 }
 0x25f   :  { %v2001_v16 = vpack.c.bf16 %v2000_v29, %v2000_v29 }
 0x261   :  { %2774 = vmatmul.mubr.msk.bf16.vlgmr.msra.gmra.mrb[92].mxu0 %vm2037_vm4, %v2001_v16 }
 0x334   :  { %v2079_v30 = vpop.f32.mrb[92].mxu0 }
 0x335   :  { %v2080_v31 = vadd.f32 %v2322_v17, %v2079_v30  ;;  %v2775_v39 = vpop.f32.mrb[93].mxu0 }
 0x336   :  { %v2082_v1 = vpop.f32.mrb[94].mxu0 }
 0x337   :  { %2085 = vmax.xlane.f32.xlu0 %v2080_v31  ;;  %v2776_v48 = vpop.f32.mrb[95].mxu0 }
 0x3c4   :  { %v2086_v49 = vpop.xlane.xlu0 %2085 }
 0x3c5   :  { %v2087_v50 = vsub.f32 %v2080_v31, %v2086_v49 }
 0x3c7   :  { %v2088_v27 = vmul.f32 1.442695, %v2087_v50 }
 0x3c9   :  { %2927 = vpow2.f32 %v2088_v27 }
 0x3d3   :  { %v2928_v28 = vpop.eup %2927 }
 0x3d4   :  { %2090 = vadd.xlane.f32.xlu0 %v2928_v28 }
 0x461   :  { %v2091_v33 = vpop.xlane.xlu0 %2090 }
 0x462   :  { %2929 = vrcp.f32 %v2091_v33 }
 0x46c   :  { %v2930_v4 = vpop.eup %2929 }
 0x46d   :  { %v2093_v7 = vmul.f32 %v2930_v4, %v2928_v28 }
 0x46f   :  { %2094 = vst [vmem:[%s3676_s7] sm:$0xff] %v2093_v7 }

</bundles_post_ra>
